<compile_context>
chip_gen: v7x
topology: tpu7x:2x2x1
jax: 0.10.0
libtpu: 0.0.40
codegen_flags: <defaults>
</compile_context>

<pallas_src>
import math

import jax
import jax.numpy as jnp
from jax.experimental import pallas as pl
from jax.experimental.pallas import tpu as pltpu


def make_effective_weight(weight, multiplier):
    # weight: (Cin, Cout, k, k) -> (Cin, Cout, k+1, k+1), matches the PyTorch fusion.
    w = weight * multiplier
    w = jnp.pad(w, ((0, 0), (0, 0), (1, 1), (1, 1)))
    return (w[:, :, 1:, 1:] + w[:, :, :-1, 1:]
            + w[:, :, 1:, :-1] + w[:, :, :-1, :-1]) / 4.0


def pack_phase_weights(w_eff, pad):
    """Pack the 4 sub-pixel phase kernels into one (4*Cout, U*U*Cin) matrix.

    Row (rh*2 + rw)*Cout + co, column (uh*U + uw)*Cin + ci is the tap that
    multiplies x[ci, a + e_min + uh, b + e_min + uw] when producing
    out[co, 2a + rh, 2b + rw]; taps a phase does not use are zero.
    """
    Cin, Cout, K, _ = w_eff.shape
    T = K // 2
    U = T + (pad & 1)
    e_min = pad // 2 - (T - 1)
    packed = jnp.zeros((4 * Cout, U * U * Cin), jnp.float32)
    for rh in range(2):
        for rw in range(2):
            r0 = (rh * 2 + rw) * Cout
            for mh in range(T):
                for mw in range(T):
                    kh = (rh + pad) % 2 + 2 * mh
                    kw = (rw + pad) % 2 + 2 * mw
                    uh = (rh + pad) // 2 - mh - e_min
                    uw = (rw + pad) // 2 - mw - e_min
                    c0 = (uh * U + uw) * Cin
                    blk = w_eff[:, :, kh, kw].T            # (Cout, Cin)
                    packed = packed.at[r0:r0 + Cout, c0:c0 + Cin].set(blk)
    return packed


def fused_upsample(x, weight, bias, multiplier, pad):
    """x: (N, Cin, H, W) NCHW, weight: (Cin, Cout, k, k), bias: (Cout,)."""
    N, Cin, H, W = x.shape
    Cout = weight.shape[1]
    w_eff = make_effective_weight(weight, multiplier)      # (Cin, Cout, K, K)
    K = w_eff.shape[-1]
    # TODO(synk): even kernel_size (odd effective K) needs per-parity output extents.
    assert K % 2 == 0, "kernel_size must be odd (effective K = k+1 even)"
    assert 0 <= pad <= K - 1, "unsupported padding"

    T = K // 2                      # taps per axis per output phase
    U = T + (pad & 1)               # union tap window per axis over all phases
    e_min = pad // 2 - (T - 1)      # smallest input shift used by any phase
    e_max = (1 + pad) // 2          # largest input shift used by any phase

    Ho = (H - 1) * 2 - 2 * pad + K
    Wo = (W - 1) * 2 - 2 * pad + K
    Hop, Wop = Ho // 2, Wo // 2     # per-phase output extent (exact since K even)

    # Zero-pad x just enough that every union-tap window stays in bounds.
    pt = max(0, -e_min)
    pb = max(0, Hop - 1 + e_max - (H - 1))
    plft = max(0, -e_min)
    prt = max(0, Wop - 1 + e_max - (W - 1))
    x_pad = jnp.pad(x, ((0, 0), (0, 0), (pt, pb), (plft, prt)))
    Hp, Wp = H + pt + pb, W + plft + prt
    base_h, base_w = pt + e_min, plft + e_min   # window origin for union tap 0

    UUC = U * U * Cin
    w_packed = pack_phase_weights(w_eff, pad)              # (4*Cout, UUC)
    b_packed = jnp.tile(bias.astype(jnp.float32).reshape(1, Cout),
                        (4, 1)).reshape(4 * Cout, 1)

    def kernel(x_ref, w_ref, b_ref, o_ref, cols_ref):
        # im2col: one shifted window per union tap, flattened spatial minor.
        for uh in range(U):
            for uw in range(U):
                r0 = (uh * U + uw) * Cin
                win = x_ref[0, :, base_h + uh:base_h + uh + Hop,
                                  base_w + uw:base_w + uw + Wop]
                cols_ref[r0:r0 + Cin, :] = win.reshape(Cin, Hop * Wop)
        # One MXU matmul for all 4 phases + in-kernel bias, lane-dense output.
        acc = jnp.dot(w_ref[...], cols_ref[...],
                      preferred_element_type=jnp.float32) + b_ref[...]
        o_ref[0, :, :] = acc.astype(o_ref.dtype)

    out_ph = pl.pallas_call(
        kernel,
        out_shape=jax.ShapeDtypeStruct((N, 4 * Cout, Hop * Wop), x.dtype),
        grid=(N,),
        in_specs=[
            pl.BlockSpec((1, Cin, Hp, Wp), lambda n: (n, 0, 0, 0)),
            pl.BlockSpec((4 * Cout, UUC), lambda n: (0, 0)),
            pl.BlockSpec((4 * Cout, 1), lambda n: (0, 0)),
        ],
        out_specs=pl.BlockSpec((1, 4 * Cout, Hop * Wop), lambda n: (n, 0, 0)),
        scratch_shapes=[pltpu.VMEM((UUC, Hop * Wop), jnp.float32)],
        compiler_params=pltpu.CompilerParams(
            dimension_semantics=("parallel",)),
    )(x_pad, w_packed, b_packed)

    # Un-scramble phases: (N, rh, rw, Cout, a, b) -> (N, Cout, a, rh, b, rw);
    # the (a,rh)/(b,rw) collapse to (Ho, Wo) is then a free row-major reshape.
    out = out_ph.reshape(N, 2, 2, Cout, Hop, Wop)
    out = jnp.transpose(out, (0, 3, 4, 1, 5, 2)).reshape(N, Cout, Ho, Wo)
    return out


def reference_forward(x, weight, bias, multiplier, pad):
    """Pure-JAX reference via XLA dilated conv (== conv_transpose2d)."""
    Cin, Cout, _, _ = weight.shape
    w_eff = make_effective_weight(weight, multiplier)
    K = w_eff.shape[-1]
    p = K - 1 - pad
    assert p >= 0
    w_oihw = jnp.transpose(w_eff, (1, 0, 2, 3))[:, :, ::-1, ::-1]
    dn = jax.lax.conv_dimension_numbers(x.shape, w_oihw.shape,
                                        ('NCHW', 'OIHW', 'NCHW'))
    out = jax.lax.conv_general_dilated(
        x, w_oihw, window_strides=(1, 1),
        padding=((p, p), (p, p)), lhs_dilation=(2, 2), rhs_dilation=(1, 1),
        dimension_numbers=dn)
    return out + bias.reshape(1, Cout, 1, 1)


if __name__ == "__main__":
    # StyleGAN-like small config: in=4, out=4, kernel=3, padding=1.
    in_channel, out_channel, kernel_size, padding = 4, 4, 3, 1
    N, H, W = 2, 16, 16

    key = jax.random.PRNGKey(0)
    kw_, kb_, kx_ = jax.random.split(key, 3)
    weight = jax.random.normal(kw_, (in_channel, out_channel,
                                     kernel_size, kernel_size), jnp.float32)
    bias = 0.1 * jax.random.normal(kb_, (out_channel,), jnp.float32)
    multiplier = math.sqrt(2.0 / (in_channel * kernel_size * kernel_size))
    x = jax.random.normal(kx_, (N, in_channel, H, W), jnp.float32)

    out = jax.block_until_ready(
        fused_upsample(x, weight, bias, multiplier, padding))
    ref = jax.block_until_ready(
        reference_forward(x, weight, bias, multiplier, padding))

    assert out.shape == (N, out_channel, 2 * H, 2 * W), out.shape
    assert jnp.allclose(out, ref, atol=1e-3, rtol=1e-3), (
        float(jnp.max(jnp.abs(out - ref))))
    print("KERNEL_OK")
</pallas_src>

<mosaic_0001>
module attributes {stable_mosaic.version = 11 : i64} {
  func.func @kernel(%arg0: i32, %arg1: memref<1x4x18x18xf32, #tpu.memory_space<vmem>>, %arg2: memref<16x36xf32, #tpu.memory_space<vmem>>, %arg3: memref<16x1xf32, #tpu.memory_space<vmem>>, %arg4: memref<1x16x256xf32, #tpu.memory_space<vmem>>, %arg5: memref<36x256xf32, #tpu.memory_space<vmem>>) attributes {dimension_semantics = [#tpu.dimension_semantics<parallel>], iteration_bounds = array<i64: 2>, scalar_prefetch = 0 : i64, scratch_operands = 1 : i64, tpu.core_type = #tpu.core_type<tc>, window_params = [{transform_indices = @transform_0, window_bounds = array<i64: 1, 4, 18, 18>}, {pipeline_mode = #tpu.pipeline_mode<synchronous>, transform_indices = @transform_1, window_bounds = array<i64: 16, 36>}, {pipeline_mode = #tpu.pipeline_mode<synchronous>, transform_indices = @transform_2, window_bounds = array<i64: 16, 1>}, {transform_indices = @transform_3, window_bounds = array<i64: 1, 16, 256>}]} {
    %c0 = arith.constant 0 : index
    %c0_0 = arith.constant 0 : index
    %c0_1 = arith.constant 0 : index
    %c0_2 = arith.constant 0 : index
    %0 = vector.load %arg1[%c0, %c0_0, %c0_1, %c0_2] : memref<1x4x18x18xf32, #tpu.memory_space<vmem>>, vector<1x4x16x16xf32>
    %1 = vector.shape_cast %0 : vector<1x4x16x16xf32> to vector<4x16x16xf32>
    %2 = vector.shape_cast %1 : vector<4x16x16xf32> to vector<4x256xf32>
    %c0_3 = arith.constant 0 : index
    %c0_4 = arith.constant 0 : index
    %3 = vector.load %arg5[%c0_3, %c0_4] : memref<36x256xf32, #tpu.memory_space<vmem>>, vector<4x256xf32>
    tpu.vector_store %arg5[%c0_3, %c0_4], %2 {strides = array<i32>} : memref<36x256xf32, #tpu.memory_space<vmem>>, vector<4x256xf32>,
    %c0_5 = arith.constant 0 : index
    %c0_6 = arith.constant 0 : index
    %c0_7 = arith.constant 0 : index
    %c1 = arith.constant 1 : index
    %4 = vector.load %arg1[%c0_5, %c0_6, %c0_7, %c1] : memref<1x4x18x18xf32, #tpu.memory_space<vmem>>, vector<1x4x16x16xf32>
    %5 = vector.shape_cast %4 : vector<1x4x16x16xf32> to vector<4x16x16xf32>
    %6 = vector.shape_cast %5 : vector<4x16x16xf32> to vector<4x256xf32>
    %c4 = arith.constant 4 : index
    %c0_8 = arith.constant 0 : index
    %7 = vector.load %arg5[%c4, %c0_8] : memref<36x256xf32, #tpu.memory_space<vmem>>, vector<4x256xf32>
    tpu.vector_store %arg5[%c4, %c0_8], %6 {strides = array<i32>} : memref<36x256xf32, #tpu.memory_space<vmem>>, vector<4x256xf32>,
    %c0_9 = arith.constant 0 : index
    %c0_10 = arith.constant 0 : index
    %c0_11 = arith.constant 0 : index
    %c2 = arith.constant 2 : index
    %8 = vector.load %arg1[%c0_9, %c0_10, %c0_11, %c2] : memref<1x4x18x18xf32, #tpu.memory_space<vmem>>, vector<1x4x16x16xf32>
    %9 = vector.shape_cast %8 : vector<1x4x16x16xf32> to vector<4x16x16xf32>
    %10 = vector.shape_cast %9 : vector<4x16x16xf32> to vector<4x256xf32>
    %c8 = arith.constant 8 : index
    %c0_12 = arith.constant 0 : index
    %11 = vector.load %arg5[%c8, %c0_12] : memref<36x256xf32, #tpu.memory_space<vmem>>, vector<4x256xf32>
    tpu.vector_store %arg5[%c8, %c0_12], %10 {strides = array<i32>} : memref<36x256xf32, #tpu.memory_space<vmem>>, vector<4x256xf32>,
    %c0_13 = arith.constant 0 : index
    %c0_14 = arith.constant 0 : index
    %c1_15 = arith.constant 1 : index
    %c0_16 = arith.constant 0 : index
    %12 = vector.load %arg1[%c0_13, %c0_14, %c1_15, %c0_16] : memref<1x4x18x18xf32, #tpu.memory_space<vmem>>, vector<1x4x16x16xf32>
    %13 = vector.shape_cast %12 : vector<1x4x16x16xf32> to vector<4x16x16xf32>
    %14 = vector.shape_cast %13 : vector<4x16x16xf32> to vector<4x256xf32>
    %c12 = arith.constant 12 : index
    %c0_17 = arith.constant 0 : index
    %15 = vector.load %arg5[%c12, %c0_17] : memref<36x256xf32, #tpu.memory_space<vmem>>, vector<4x256xf32>
    tpu.vector_store %arg5[%c12, %c0_17], %14 {strides = array<i32>} : memref<36x256xf32, #tpu.memory_space<vmem>>, vector<4x256xf32>,
    %c0_18 = arith.constant 0 : index
    %c0_19 = arith.constant 0 : index
    %c1_20 = arith.constant 1 : index
    %c1_21 = arith.constant 1 : index
    %16 = vector.load %arg1[%c0_18, %c0_19, %c1_20, %c1_21] : memref<1x4x18x18xf32, #tpu.memory_space<vmem>>, vector<1x4x16x16xf32>
    %17 = vector.shape_cast %16 : vector<1x4x16x16xf32> to vector<4x16x16xf32>
    %18 = vector.shape_cast %17 : vector<4x16x16xf32> to vector<4x256xf32>
    %c16 = arith.constant 16 : index
    %c0_22 = arith.constant 0 : index
    %19 = vector.load %arg5[%c16, %c0_22] : memref<36x256xf32, #tpu.memory_space<vmem>>, vector<4x256xf32>
    tpu.vector_store %arg5[%c16, %c0_22], %18 {strides = array<i32>} : memref<36x256xf32, #tpu.memory_space<vmem>>, vector<4x256xf32>,
    %c0_23 = arith.constant 0 : index
    %c0_24 = arith.constant 0 : index
    %c1_25 = arith.constant 1 : index
    %c2_26 = arith.constant 2 : index
    %20 = vector.load %arg1[%c0_23, %c0_24, %c1_25, %c2_26] : memref<1x4x18x18xf32, #tpu.memory_space<vmem>>, vector<1x4x16x16xf32>
    %21 = vector.shape_cast %20 : vector<1x4x16x16xf32> to vector<4x16x16xf32>
    %22 = vector.shape_cast %21 : vector<4x16x16xf32> to vector<4x256xf32>
    %c20 = arith.constant 20 : index
    %c0_27 = arith.constant 0 : index
    %23 = vector.load %arg5[%c20, %c0_27] : memref<36x256xf32, #tpu.memory_space<vmem>>, vector<4x256xf32>
    tpu.vector_store %arg5[%c20, %c0_27], %22 {strides = array<i32>} : memref<36x256xf32, #tpu.memory_space<vmem>>, vector<4x256xf32>,
    %c0_28 = arith.constant 0 : index
    %c0_29 = arith.constant 0 : index
    %c2_30 = arith.constant 2 : index
    %c0_31 = arith.constant 0 : index
    %24 = vector.load %arg1[%c0_28, %c0_29, %c2_30, %c0_31] : memref<1x4x18x18xf32, #tpu.memory_space<vmem>>, vector<1x4x16x16xf32>
    %25 = vector.shape_cast %24 : vector<1x4x16x16xf32> to vector<4x16x16xf32>
    %26 = vector.shape_cast %25 : vector<4x16x16xf32> to vector<4x256xf32>
    %c24 = arith.constant 24 : index
    %c0_32 = arith.constant 0 : index
    %27 = vector.load %arg5[%c24, %c0_32] : memref<36x256xf32, #tpu.memory_space<vmem>>, vector<4x256xf32>
    tpu.vector_store %arg5[%c24, %c0_32], %26 {strides = array<i32>} : memref<36x256xf32, #tpu.memory_space<vmem>>, vector<4x256xf32>,
    %c0_33 = arith.constant 0 : index
    %c0_34 = arith.constant 0 : index
    %c2_35 = arith.constant 2 : index
    %c1_36 = arith.constant 1 : index
    %28 = vector.load %arg1[%c0_33, %c0_34, %c2_35, %c1_36] : memref<1x4x18x18xf32, #tpu.memory_space<vmem>>, vector<1x4x16x16xf32>
    %29 = vector.shape_cast %28 : vector<1x4x16x16xf32> to vector<4x16x16xf32>
    %30 = vector.shape_cast %29 : vector<4x16x16xf32> to vector<4x256xf32>
    %c28 = arith.constant 28 : index
    %c0_37 = arith.constant 0 : index
    %31 = vector.load %arg5[%c28, %c0_37] : memref<36x256xf32, #tpu.memory_space<vmem>>, vector<4x256xf32>
    tpu.vector_store %arg5[%c28, %c0_37], %30 {strides = array<i32>} : memref<36x256xf32, #tpu.memory_space<vmem>>, vector<4x256xf32>,
    %c0_38 = arith.constant 0 : index
    %c0_39 = arith.constant 0 : index
    %c2_40 = arith.constant 2 : index
    %c2_41 = arith.constant 2 : index
    %32 = vector.load %arg1[%c0_38, %c0_39, %c2_40, %c2_41] : memref<1x4x18x18xf32, #tpu.memory_space<vmem>>, vector<1x4x16x16xf32>
    %33 = vector.shape_cast %32 : vector<1x4x16x16xf32> to vector<4x16x16xf32>
    %34 = vector.shape_cast %33 : vector<4x16x16xf32> to vector<4x256xf32>
    %c32 = arith.constant 32 : index
    %c0_42 = arith.constant 0 : index
    %35 = vector.load %arg5[%c32, %c0_42] : memref<36x256xf32, #tpu.memory_space<vmem>>, vector<4x256xf32>
    tpu.vector_store %arg5[%c32, %c0_42], %34 {strides = array<i32>} : memref<36x256xf32, #tpu.memory_space<vmem>>, vector<4x256xf32>,
    %c0_43 = arith.constant 0 : index
    %c0_44 = arith.constant 0 : index
    %36 = vector.load %arg2[%c0_43, %c0_44] : memref<16x36xf32, #tpu.memory_space<vmem>>, vector<16x36xf32>
    %c0_45 = arith.constant 0 : index
    %c0_46 = arith.constant 0 : index
    %37 = vector.load %arg5[%c0_45, %c0_46] : memref<36x256xf32, #tpu.memory_space<vmem>>, vector<36x256xf32>
    %cst = arith.constant dense<0.000000e+00> : vector<16x256xf32>
    %38 = tpu.matmul %36, %37, %cst {dimension_numbers = #tpu.dot_dimension_numbers<[1], [0], [0], [1], [0, 0, 1, 1], [], []>} : vector<16x36xf32>, vector<36x256xf32>, vector<16x256xf32> -> vector<16x256xf32>
    %c0_47 = arith.constant 0 : index
    %c0_48 = arith.constant 0 : index
    %39 = vector.load %arg3[%c0_47, %c0_48] : memref<16x1xf32, #tpu.memory_space<vmem>>, vector<16x1xf32>
    %40 = vector.broadcast %39 : vector<16x1xf32> to vector<16x256xf32>
    %41 = arith.addf %38, %40 : vector<16x256xf32>
    %c0_49 = arith.constant 0 : index
    %c0_50 = arith.constant 0 : index
    %c0_51 = arith.constant 0 : index
    %42 = vector.load %arg4[%c0_49, %c0_50, %c0_51] : memref<1x16x256xf32, #tpu.memory_space<vmem>>, vector<1x16x256xf32>
    %43 = vector.shape_cast %42 : vector<1x16x256xf32> to vector<16x256xf32>
    %44 = vector.shape_cast %41 : vector<16x256xf32> to vector<1x16x256xf32>
    tpu.vector_store %arg4[%c0_49, %c0_50, %c0_51], %44 {strides = array<i32>} : memref<1x16x256xf32, #tpu.memory_space<vmem>>, vector<1x16x256xf32>,
    return
  }
  func.func @transform_0(%arg0: i32) -> (i32, i32, i32, i32) {
    %c0_i32 = arith.constant 0 : i32
    %c0_i32_0 = arith.constant 0 : i32
    %c0_i32_1 = arith.constant 0 : i32
    %c0_i32_2 = arith.constant 0 : i32
    return %arg0, %c0_i32, %c0_i32_0, %c0_i32_1 : i32, i32, i32, i32
  }
  func.func @transform_1(%arg0: i32) -> (i32, i32) {
    %c0_i32 = arith.constant 0 : i32
    %c0_i32_0 = arith.constant 0 : i32
    %c0_i32_1 = arith.constant 0 : i32
    return %c0_i32, %c0_i32_0 : i32, i32
  }
  func.func @transform_2(%arg0: i32) -> (i32, i32) {
    %c0_i32 = arith.constant 0 : i32
    %c0_i32_0 = arith.constant 0 : i32
    %c0_i32_1 = arith.constant 0 : i32
    return %c0_i32, %c0_i32_0 : i32, i32
  }
  func.func @transform_3(%arg0: i32) -> (i32, i32, i32) {
    %c0_i32 = arith.constant 0 : i32
    %c0_i32_0 = arith.constant 0 : i32
    %c0_i32_1 = arith.constant 0 : i32
    return %arg0, %c0_i32, %c0_i32_0 : i32, i32, i32
  }
}

</mosaic_0001>

<bundles_post_ra>
// kernel: tpu_custom_call.1
= control target key start
LH: loop header
LB: loop body
LE: loop exit
PB: predicated region body
PF: predicated region fallthrough
CT: control target
= control target key end

     0   :  { %8 = vsyncpa [#allocation4], 0  ;;  %s4241_s0 = inlined_call_operand.vmem [shape: f32[2,4,18,18], index: 0, kind: input, shape index: {}]   ;;  %s4242_s1 = inlined_call_operand.vmem [shape: f32[16,36], index: 1, kind: input, shape index: {}]   ;;  %s4243_s2 = inlined_call_operand.vmem [shape: f32[16,1], index: 2, kind: input, shape index: {}]   ;;  %s4244_s3 = inlined_call_operand.hbm [shape: f32[2,16,256], index: 3, kind: output, shape index: {}]  }
   0x1   :  { %10 = vsyncpa [#allocation4 + $0x1], 0  ;;  %s2740_s12 = smov 0   ;;  %s2742_s13 = smov 0  }
   0x2   :  { %s2744_s14 = smov 0   ;;  %s2746_s15 = smov 0  }
   0x3 LB: > { %s2761_s16 = sadd.s32 4294967295, %s2703_s15   ;;  %s2531_s17 = sadd.s32 4294967294, %s2703_s15   ;;  %s2703_s15 = sphi %s2746_s15, %s4338_s15   ;;  %s2699_s14 = sphi %s2744_s14, %s4337_s14   ;;  %s2695_s13 = sphi %s2742_s13, %s4336_s13   ;;  %s2691_s12 = sphi %s2740_s12, %s4335_s12  }
   0x4   : > { %s2765_s18 = sadd.s32 1, %s2703_s15   ;;  %s91_s19 = sadd.s32 1, %s2699_s14 }
   0x5   : > { %s88_s20 = ssub.s32 %s2703_s15, %s2765_s18  ;;  %p101_p0 = scmp.ne.s32.totalorder %s2699_s14, %s2695_s13 }
   0x6   : > { %p89_p1 = scmp.eq.s32.totalorder %s88_s20, 0  ;;  %p102_p2 = scmp.eq.s32.totalorder %s2761_s16, 1 }
   0x7   : > { %p107_p3 = scmp.ne.s32.totalorder %s2695_s13, %s2691_s12  ;;  %p108_p4 = scmp.eq.s32.totalorder %s2531_s17, 1 }
   0x8   : > { %s2776_s21 = scalar_select %p89_p1, %s2699_s14, %s91_s19  }
   0x9   : > { %p2778_p5 = por %p102_p2, %p101_p0  ;;  %p2782_p6 = por %p108_p4, %p107_p3 }
   0xa   : > { %p2534_p7 = scmp.ge.s32.totalorder %s2703_s15, 1  ;;  %p140_p8 = scmp.lt.s32.totalorder %s2703_s15, 3 }
   0xc   : > { %p141_p9 = pnand %p2534_p7, %p140_p8 }
   0xe   : > { %144 = sbr.rel (%p141_p9) target bundleno = 750 (0x2ee), region = 32 }
  0x15   : > { %p164_p10 = scmp.lt.s32.totalorder %s2761_s16, 1  ;;  %v182_v0 = vlaneseq  ;;  %v2705_v1 = vmov 1983009808   ;;  %v4245_v3 = vmov 0.0   ;;  %s2707_s29 = smov 127   ;;  %vm369_vm0 = vcmask 130048  }
  0x16   : > { %v180_v2 = vunpack.c.l.s4 %v2705_v1  ;;  %2438 = vmatprep.mubr.f32.mxu0 %v4245_v3  ;;  %2444 = vmatprep.mubr.f32.mxu1 %v4245_v3  ;;  %s2708_s30 = smov 126   ;;  %v2709_v60 = vmov 1934713408   ;;  %s2710_s4 = smov 16   ;;  %vm371_vm1 = vcmask 261120   ;;  %vm373_vm2 = vcmask 392192  }
  0x17   : > { %s165_s24 = scalar_select %p164_p10, %s2761_s16, 1  ;;  %v2792_v5 = vshrl.u32 %v182_v0, 7  ;;  %v212_v61 = vunpack.c.l.s4 %v2709_v60  ;;  %vm377_vm3 = vcmask 654336   ;;  %vm375_vm4 = vcmask 523264  }
  0x18   : > { %v181_v4 = vunpack.c.0.s8 %v180_v2  ;;  %s2711_s5 = smov 32   ;;  %s2712_s6 = smov 48   ;;  %vm379_vm5 = vcmask 785408   ;;  %vm381_vm6 = vcmask 916480   ;;  %vm2367_vm7 = vcmask 1043456  }
  0x19   : > { %s2561_s25 = smul.u32 96, %s165_s24  ;;  %v213_v2 = vunpack.c.0.s8 %v212_v61  ;;  %s2713_s7 = smov 64   ;;  %vm2360_vm8 = vcmask 293888  }
  0x1a   : > { %v2809_v11 = vsub.s32 %v181_v4, %v2792_v5  ;;  %s2714_s8 = smov 80   ;;  %s2715_s9 = smov 96  }
  0x1b   : > { %s2797_s28 = scalar_lea.vmem %s4241_s0, %s2561_s25  ;;  %s2716_s10 = smov 112  }
  0x1c   : > { %v397_v6 = vld [vmem:[%s2797_s28 + $0x38] sm:$0xff]  ;;  %v393_v7 = vld [vmem:[%s2797_s28 + $0x8] sm:$0xff]  ;;  %v399_v8 = vld [vmem:[%s2797_s28 + $0x50] sm:$0xff]  ;;  %s2718_s11 = smov [#allocation3]  }
  0x1d   : > { %418 = vrot.lane.b32.xlu1 %v397_v6, %s2707_s29  ;;  %410 = vrot.lane.b32.xlu0 %v393_v7, %s2707_s29  ;;  %v395_v9 = vld [vmem:[%s2797_s28 + $0x20] sm:$0xff]  ;;  %v2806_v10 = vld [vmem:[%s2797_s28 + $0x18] sm:$0xff]  ;;  %v245_v12 = vcombine.low %v393_v7, %v397_v6  ;;  %v246_v38 = vcombine.high %v393_v7, %v397_v6  ;;  %s2645_s17 = sshll.u32 %s2718_s11, 4  ;;  %s2646_s17 = int_to_ptr.vmem [resolvable:$false] %s2645_s17 }
  0x1e   : > { %v2812_v13 = vld [vmem:[%s2797_s28] sm:$0xff]  ;;  %v2815_v14 = vld [vmem:[%s2797_s28 + $0x48] sm:$0xff]  ;;  %v2818_v15 = vld [vmem:[%s2797_s28 + $0x30] sm:$0xff]  ;;  %v261_v16 = vcombine.low %v395_v9, %v399_v8  ;;  %v262_v39 = vcombine.high %v395_v9, %v399_v8  ;;  %s2647_s19 = scalar_lea.vmem %s2646_s17, 1024 }
  0x1f   : > { %v2821_v17 = vld [vmem:[%s2797_s28 + $0x21] sm:$0xff]  ;;  %v2824_v18 = vld [vmem:[%s2797_s28 + $0x51] sm:$0xff]  ;;  %v2827_v19 = vrot.slane %v245_v12, %v2809_v11  ;;  %v177_v20 = vcombine.low %v2812_v13, %v2818_v15  ;;  %v193_v21 = vcombine.low %v2806_v10, %v2815_v14  ;;  %v2841_v24 = vld [vmem:[%s2797_s28 + $0x9] sm:$0xff]  ;;  %v2909_v40 = vrot.slane %v246_v38, %v2809_v11 }
  0x20   : > { %v2834_v22 = vrot.slane %v261_v16, %v2809_v11  ;;  %v987_v23 = vcombine.high %v2821_v17, %v2824_v18  ;;  %v2844_v25 = vld [vmem:[%s2797_s28 + $0x39] sm:$0xff]  ;;  %v2899_v36 = vld [vmem:[%s2797_s28 + $0x22] sm:$0xff]  ;;  %v2902_v37 = vld [vmem:[%s2797_s28 + $0xa] sm:$0xff]  ;;  %v2912_v41 = vrot.slane %v262_v39, %v2809_v11  ;;  %v178_v54 = vcombine.high %v2812_v13, %v2818_v15 }
  0x21   : > { %422 = vrot.lane.b32.xlu1 %v399_v8, %s2707_s29  ;;  %414 = vrot.lane.b32.xlu0 %v395_v9, %s2707_s29  ;;  %v2847_v26 = vrot.slane %v177_v20, %v2809_v11  ;;  %v2850_v27 = vrot.slane %v193_v21, %v2809_v11  ;;  %v971_v30 = vcombine.high %v2841_v24, %v2844_v25  ;;  %v2915_v42 = vld [vmem:[%s2797_s28 + $0x52] sm:$0xff]  ;;  %v2918_v43 = vld [vmem:[%s2797_s28 + $0x3a] sm:$0xff] }
  0x22   : > { %v277_v28 = vcombine.low %v2827_v19, %v2834_v22  ;;  %v278_v29 = vcombine.high %v2827_v19, %v2834_v22  ;;  %v2861_v32 = vrot.slane %v987_v23, %v2809_v11  ;;  %v2927_v45 = vld [vmem:[%s2797_s28 + $0x1] sm:$0xff]  ;;  %v2930_v46 = vld [vmem:[%s2797_s28 + $0x19] sm:$0xff]  ;;  %v2937_v47 = vld [vmem:[%s2797_s28 + $0x31] sm:$0xff]  ;;  %v194_v55 = vcombine.high %v2806_v10, %v2815_v14 }
  0x23   : > { %v209_v31 = vcombine.low %v2847_v26, %v2850_v27  ;;  %v2864_v33 = vrot.slane %v971_v30, %v2809_v11  ;;  %v210_v35 = vcombine.high %v2847_v26, %v2850_v27  ;;  %v2940_v48 = vld [vmem:[%s2797_s28 + $0x49] sm:$0xff]  ;;  %v2950_v50 = vld [vmem:[%s2797_s28 + $0x1a] sm:$0xff]  ;;  %v2959_v52 = vld [vmem:[%s2797_s28 + $0x32] sm:$0xff]  ;;  %v2981_v56 = vrot.slane %v178_v54, %v2809_v11 }
  0x24   : > { %v2947_v49 = vld [vmem:[%s2797_s28 + $0x2] sm:$0xff]  ;;  %v2962_v53 = vld [vmem:[%s2797_s28 + $0x4a] sm:$0xff]  ;;  %v2984_v57 = vrot.slane %v194_v55, %v2809_v11  ;;  %v986_v59 = vcombine.low %v2821_v17, %v2824_v18  ;;  %v902_v62 = vcombine.low %v2927_v45, %v2937_v47  ;;  %v918_v63 = vcombine.low %v2930_v46, %v2940_v48  ;;  %s161_s28 = sand.u32 1, %s2695_s13  }
  0x25   : > { %412 = vrot.lane.b32.xlu1 %v2806_v10, %s2707_s29  ;;  %408 = vrot.lane.b32.xlu0 %v2812_v13, %s2707_s29  ;;  %v1018_v34 = vcombine.low %v2864_v33, %v2861_v32  ;;  %v970_v0 = vcombine.low %v2841_v24, %v2844_v25 }
  0x26   : > { %v994_v1 = vrot.slane %v986_v59, %v2809_v11  ;;  %v910_v4 = vrot.slane %v902_v62, %v2809_v11 }
  0x29   : > { %420 = vrot.lane.b32.xlu1 %v2815_v14, %s2707_s29  ;;  %416 = vrot.lane.b32.xlu0 %v2818_v15, %s2707_s29 }
  0x2d   : > { %668 = vrot.lane.b32.xlu1 %v395_v9, %s2708_s30  ;;  %664 = vrot.lane.b32.xlu0 %v393_v7, %s2708_s30  ;;  %v978_v7 = vrot.slane %v970_v0, %v2809_v11 }
  0x2f   : > { %v1003_v16 = vcombine.high %v978_v7, %v994_v1 }
  0x31   : > { %676 = vrot.lane.b32.xlu1 %v399_v8, %s2708_s30  ;;  %672 = vrot.lane.b32.xlu0 %v397_v6, %s2708_s30  ;;  %v926_v6 = vrot.slane %v918_v63, %v2809_v11  ;;  %v3017_v8 = vsub.s32 %v213_v2, %v2792_v5 }
  0x33   : > { %v934_v9 = vcombine.low %v910_v4, %v926_v6  ;;  %v3033_v5 = vrot.slane %v277_v28, %v3017_v8  ;;  %v1017_v20 = vrot.slane %v1003_v16, %v3017_v8  ;;  %v935_v21 = vcombine.high %v910_v4, %v926_v6 }
  0x34   : > { %v3068_v30 = vrot.slane %v278_v29, %v3017_v8  ;;  %v3078_v38 = vrot.slane %v1018_v34, %v3017_v8 }
  0x35   : > { %666 = vrot.lane.b32.xlu1 %v2806_v10, %s2708_s30  ;;  %662 = vrot.lane.b32.xlu0 %v2812_v13, %s2708_s30  ;;  %v1002_v10 = vcombine.low %v978_v7, %v994_v1  ;;  %v3024_v12 = vrot.slane %v934_v9, %v3017_v8  ;;  %4275 = vst [vmem:[#allocation8_spill] sm:$0xff] %v3033_v5 }
  0x36   : > { %v949_v23 = vrot.slane %v935_v21, %v3017_v8  ;;  %v310_v7 = vcombine.high %v3068_v30, %v4245_v3 }
  0x37   : > { %4273 = vst [vmem:[#allocation6_spill] sm:$0xff] %v3024_v12  ;;  %v3027_v13 = vrot.slane %v1002_v10, %v3017_v8 }
  0x39   : > { %674 = vrot.lane.b32.xlu1 %v2815_v14, %s2708_s30  ;;  %670 = vrot.lane.b32.xlu0 %v2818_v15, %s2708_s30  ;;  %4274 = vst [vmem:[#allocation7_spill] sm:$0xff] %v3027_v13  ;;  %v966_v14 = vcombine.high %v3024_v12, %v4245_v3  ;;  %v1034_v15 = vcombine.high %v3027_v13, %v4245_v3 }
  0x3d   : > { %1386 = vrot.lane.b32.xlu1 %v2821_v17, %s2708_s30  ;;  %1382 = vrot.lane.b32.xlu0 %v2841_v24, %s2708_s30 }
  0x41   : > { %1394 = vrot.lane.b32.xlu1 %v2824_v18, %s2708_s30  ;;  %1390 = vrot.lane.b32.xlu0 %v2844_v25, %s2708_s30 }
  0x45   : > { %1856 = vrot.lane.b32.xlu1 %v2899_v36, %s2707_s29  ;;  %1852 = vrot.lane.b32.xlu0 %v2902_v37, %s2707_s29 }
  0x49   : > { %1864 = vrot.lane.b32.xlu1 %v2915_v42, %s2707_s29  ;;  %1860 = vrot.lane.b32.xlu0 %v2918_v43, %s2707_s29 }
  0x4d   : > { %1380 = vrot.lane.b32.xlu0 %v2927_v45, %s2708_s30  ;;  %1384 = vrot.lane.b32.xlu1 %v2930_v46, %s2708_s30 }
  0x51   : > { %1388 = vrot.lane.b32.xlu0 %v2937_v47, %s2708_s30  ;;  %1392 = vrot.lane.b32.xlu1 %v2940_v48, %s2708_s30 }
  0x55   : > { %1850 = vrot.lane.b32.xlu0 %v2947_v49, %s2707_s29  ;;  %1854 = vrot.lane.b32.xlu1 %v2950_v50, %s2707_s29 }
  0x59   : > { %1858 = vrot.lane.b32.xlu0 %v2959_v52, %s2707_s29  ;;  %1862 = vrot.lane.b32.xlu1 %v2962_v53, %s2707_s29 }
  0x5d   : > { %1134 = vrot.lane.b32.xlu0 %v2841_v24, %s2707_s29  ;;  %1138 = vrot.lane.b32.xlu1 %v2821_v17, %s2707_s29  ;;  %v1035_v24 = vcombine.high %v1017_v20, %v4245_v3 }
  0x61   : > { %1142 = vrot.lane.b32.xlu0 %v2844_v25, %s2707_s29  ;;  %1146 = vrot.lane.b32.xlu1 %v2824_v18, %s2707_s29  ;;  %v309_v18 = vcombine.high %v3033_v5, %v4245_v3  ;;  %v3058_v25 = vrot.slane %v209_v31, %v3017_v8  ;;  %v967_v31 = vcombine.high %v949_v23, %v4245_v3  ;;  %v4282_v5 = vmov 0.0  }
  0x63   : > { %4276 = vst [vmem:[#allocation9_spill] sm:$0xff] %v3058_v25  ;;  %v241_v28 = vcombine.high %v3058_v25, %v4245_v3 }
  0x65   : > { %1132 = vrot.lane.b32.xlu0 %v2927_v45, %s2707_s29  ;;  %1136 = vrot.lane.b32.xlu1 %v2930_v46, %s2707_s29 }
  0x69   : > { %1140 = vrot.lane.b32.xlu0 %v2937_v47, %s2707_s29  ;;  %1144 = vrot.lane.b32.xlu1 %v2940_v48, %s2707_s29  ;;  %s2535_s29 = sshll.u32 %s161_s28, 5 }
  0x6d   : > { %2106 = vrot.lane.b32.xlu0 %v2902_v37, %s2708_s30  ;;  %2110 = vrot.lane.b32.xlu1 %v2899_v36, %s2708_s30 }
  0x71   : > { %2114 = vrot.lane.b32.xlu0 %v2918_v43, %s2708_s30  ;;  %2118 = vrot.lane.b32.xlu1 %v2915_v42, %s2708_s30 }
  0x75   : > { %2104 = vrot.lane.b32.xlu0 %v2947_v49, %s2708_s30  ;;  %2108 = vrot.lane.b32.xlu1 %v2950_v50, %s2708_s30 }
  0x79   : > { %2112 = vrot.lane.b32.xlu0 %v2959_v52, %s2708_s30  ;;  %2116 = vrot.lane.b32.xlu1 %v2962_v53, %s2708_s30  ;;  %s163_s30 = scalar_lea.vmem [#allocation3], %s2535_s29 }
  0x7d   : > { %1039 = vrot.lane.b32.xlu0 %v966_v14, %s2710_s4  ;;  %1067 = vrot.lane.b32.xlu1 %v1034_v15, %s2710_s4 }
  0x81   : > { %342 = vrot.lane.b32.xlu0 %v309_v18, %s2710_s4  ;;  %1071 = vrot.lane.b32.xlu1 %v1017_v20, %s2711_s5 }
  0x85   : > { %1043 = vrot.lane.b32.xlu0 %v949_v23, %s2711_s5  ;;  %1075 = vrot.lane.b32.xlu1 %v1035_v24, %s2712_s6 }
  0x89   : > { %314 = vrot.lane.b32.xlu0 %v241_v28, %s2710_s4  ;;  %346 = vrot.lane.b32.xlu1 %v3068_v30, %s2711_s5 }
  0x8d   : > { %1047 = vrot.lane.b32.xlu0 %v967_v31, %s2712_s6  ;;  %1079 = vrot.lane.b32.xlu1 %v3078_v38, %s2713_s7 }
  0x8f   : > { %v419_v19 = vpop.permute.xlu1 %418  ;;  %v411_v22 = vpop.permute.xlu0 %410 }
  0x90   : > { %v500_v29 = vcombine.low %v411_v22, %v419_v19  ;;  %v501_v9 = vcombine.high %v411_v22, %v419_v19 }
  0x92   : > { %v508_v59 = vrot.slane %v500_v29, %v2809_v11  ;;  %v3111_v24 = vrot.slane %v501_v9, %v2809_v11 }
  0x93   : > { %v423_v39 = vpop.permute.xlu1 %422  ;;  %v415_v54 = vpop.permute.xlu0 %414 }
  0x94   : > { %v516_v55 = vcombine.low %v415_v54, %v423_v39  ;;  %v517_v0 = vcombine.high %v415_v54, %v423_v39 }
  0x96   : > { %v524_v60 = vrot.slane %v516_v55, %v2809_v11  ;;  %v3101_v16 = vrot.slane %v517_v0, %v2809_v11 }
  0x97   : > { %v3085_v61 = vpop.permute.xlu1 %412  ;;  %v3087_v34 = vpop.permute.xlu0 %408 }
  0x98   : > { %v532_v62 = vcombine.low %v508_v59, %v524_v60  ;;  %v533_v63 = vcombine.high %v508_v59, %v524_v60  ;;  %v548_v29 = vcombine.low %v3111_v24, %v3101_v16 }
  0x9a   : > { %v547_v1 = vrot.slane %v533_v63, %v3017_v8  ;;  %v3091_v2 = vrot.slane %v532_v62, %v3017_v8  ;;  %v556_v0 = vrot.slane %v548_v29, %v3017_v8 }
  0x9b   : > { %v421_v4 = vpop.permute.xlu1 %420  ;;  %v417_v6 = vpop.permute.xlu0 %416 }
  0x9c   : > { %4277 = vst [vmem:[#allocation10_spill] sm:$0xff] %v3091_v2  ;;  %v448_v10 = vcombine.low %v3085_v61, %v421_v4  ;;  %v432_v14 = vcombine.low %v3087_v34, %v417_v6  ;;  %601 = vrot.lane.b32.xlu1 %v547_v1, %s2711_s5  ;;  %v564_v15 = vcombine.high %v3091_v2, %v4245_v3 }
  0x9e   : > { %v456_v18 = vrot.slane %v448_v10, %v2809_v11  ;;  %v440_v20 = vrot.slane %v432_v14, %v2809_v11  ;;  %597 = vrot.lane.b32.xlu0 %v564_v15, %s2710_s4 }
  0x9f   : > { %v3106_v21 = vpop.permute.xlu1 %668  ;;  %v3108_v23 = vpop.permute.xlu0 %664 }
  0xa0   : > { %v464_v28 = vcombine.low %v440_v20, %v456_v18  ;;  %v465_v31 = vcombine.high %v440_v20, %v456_v18  ;;  %v565_v18 = vcombine.high %v547_v1, %v4245_v3 }
  0xa2   : > { %v479_v19 = vrot.slane %v465_v31, %v3017_v8  ;;  %v3115_v22 = vrot.slane %v464_v28, %v3017_v8 }
  0xa3   : > { %v3119_v39 = vpop.permute.xlu1 %676  ;;  %v3121_v54 = vpop.permute.xlu0 %672 }
  0xa4   : > { %4278 = vst [vmem:[#allocation11_spill] sm:$0xff] %v3115_v22  ;;  %v770_v55 = vcombine.low %v3106_v21, %v3119_v39  ;;  %v754_v59 = vcombine.low %v3108_v23, %v3121_v54  ;;  %573 = vrot.lane.b32.xlu1 %v479_v19, %s2711_s5  ;;  %v496_v60 = vcombine.high %v3115_v22, %v4245_v3 }
  0xa5   : > { %v497_v1 = vcombine.high %v479_v19, %v4245_v3  ;;  %v449_v19 = vcombine.high %v3085_v61, %v421_v4  ;;  %v566_v61 = vcombine.high %v556_v0, %v4245_v3 }
  0xa6   : > { %v778_v62 = vrot.slane %v770_v55, %v2809_v11  ;;  %v762_v63 = vrot.slane %v754_v59, %v2809_v11  ;;  %569 = vrot.lane.b32.xlu0 %v496_v60, %s2710_s4 }
  0xa7   : > { %v3134_v9 = vpop.permute.xlu1 %666  ;;  %v3136_v10 = vpop.permute.xlu0 %662  ;;  %v3178_v58 = vrot.slane %v449_v19, %v2809_v11 }
  0xa8   : > { %v786_v14 = vcombine.low %v762_v63, %v778_v62  ;;  %609 = vrot.lane.b32.xlu1 %v556_v0, %s2713_s7  ;;  %v787_v15 = vcombine.high %v762_v63, %v778_v62 }
  0xaa   : > { %v801_v20 = vrot.slane %v787_v15, %v3017_v8  ;;  %v3142_v28 = vrot.slane %v786_v14, %v3017_v8  ;;  %605 = vrot.lane.b32.xlu0 %v565_v18, %s2712_s6 }
  0xab   : > { %v3145_v31 = vpop.permute.xlu1 %674  ;;  %v3147_v29 = vpop.permute.xlu0 %670 }
  0xac   : > { %4279 = vst [vmem:[#allocation12_spill] sm:$0xff] %v3142_v28  ;;  %v702_v55 = vcombine.low %v3134_v9, %v3145_v31  ;;  %v686_v59 = vcombine.low %v3136_v10, %v3147_v29  ;;  %855 = vrot.lane.b32.xlu1 %v801_v20, %s2711_s5  ;;  %v818_v63 = vcombine.high %v3142_v28, %v4245_v3 }
  0xad   : > { %v819_v26 = vcombine.high %v801_v20, %v4245_v3  ;;  %v1036_v20 = vcombine.high %v3078_v38, %v4245_v3  ;;  %v771_v28 = vcombine.high %v3106_v21, %v3119_v39 }
  0xae   : > { %v710_v60 = vrot.slane %v702_v55, %v2809_v11  ;;  %v694_v62 = vrot.slane %v686_v59, %v2809_v11  ;;  %577 = vrot.lane.b32.xlu0 %v497_v1, %s2712_s6  ;;  %v433_v55 = vcombine.high %v3087_v34, %v417_v6  ;;  %v224_v6 = vrot.slane %v210_v35, %v3017_v8 }
  0xaf   : > { %v3160_v14 = vpop.permute.xlu1 %1386  ;;  %v3162_v15 = vpop.permute.xlu0 %1382 }
  0xb0   : > { %v718_v18 = vcombine.low %v694_v62, %v710_v60  ;;  %851 = vrot.lane.b32.xlu1 %v818_v63, %s2710_s4  ;;  %v3181_v63 = vrot.slane %v433_v55, %v2809_v11 }
  0xb2   : > { %v3170_v59 = vrot.slane %v718_v18, %v3017_v8  ;;  %v919_v18 = vcombine.high %v2930_v46, %v2940_v48  ;;  %v480_v55 = vcombine.low %v3181_v63, %v3178_v58 }
  0xb3   : > { %v3172_v17 = vpop.permute.xlu1 %1394  ;;  %v3174_v1 = vpop.permute.xlu0 %1390 }
  0xb4   : > { %4280 = vst [vmem:[#allocation13_spill] sm:$0xff] %v3170_v59  ;;  %350 = vrot.lane.b32.xlu1 %v310_v7, %s2712_s6  ;;  %v750_v30 = vcombine.high %v3170_v59, %v4245_v3  ;;  %v903_v7 = vcombine.high %v2927_v45, %v2937_v47  ;;  %v1488_v0 = vcombine.low %v3160_v14, %v3172_v17 }
  0xb5   : > { %v1472_v19 = vcombine.low %v3162_v15, %v3174_v1  ;;  %v3216_v46 = vrot.slane %v919_v18, %v2809_v11  ;;  %v719_v18 = vcombine.high %v694_v62, %v710_v60 }
  0xb6   : > { %823 = vrot.lane.b32.xlu0 %v750_v30, %s2710_s4  ;;  %v3213_v45 = vrot.slane %v903_v7, %v2809_v11  ;;  %v3226_v30 = vrot.slane %v1488_v0, %v2809_v11  ;;  %v488_v7 = vrot.slane %v480_v55, %v3017_v8 }
  0xb7   : > { %v3187_v34 = vpop.permute.xlu1 %1856  ;;  %v3189_v4 = vpop.permute.xlu0 %1852  ;;  %v733_v62 = vrot.slane %v719_v18, %v3017_v8 }
  0xb8   : > { %613 = vrot.lane.b32.xlu1 %v566_v61, %s2714_s8  ;;  %v3229_v61 = vrot.slane %v1472_v19, %v2809_v11  ;;  %v950_v38 = vcombine.low %v3213_v45, %v3216_v46 }
  0xba   : > { %318 = vrot.lane.b32.xlu0 %v224_v6, %s2711_s5  ;;  %v1504_v60 = vcombine.low %v3229_v61, %v3226_v30 }
  0xbb   : > { %v3208_v27 = vpop.permute.xlu1 %1864  ;;  %v3210_v35 = vpop.permute.xlu0 %1860 }
  0xbc   : > { %v1958_v47 = vcombine.low %v3187_v34, %v3208_v27  ;;  %v1942_v48 = vcombine.low %v3189_v4, %v3210_v35  ;;  %859 = vrot.lane.b32.xlu1 %v819_v26, %s2712_s6 }
  0xbe   : > { %v3233_v51 = vrot.slane %v1958_v47, %v2809_v11  ;;  %v3236_v44 = vrot.slane %v1942_v48, %v2809_v11  ;;  %581 = vrot.lane.b32.xlu0 %v488_v7, %s2713_s7  ;;  %v958_v47 = vrot.slane %v950_v38, %v3017_v8  ;;  %v4284_v38 = vcombine.low %v2909_v40, %v2912_v41 }
  0xbf   : > { %v3239_v26 = vpop.permute.xlu0 %1380  ;;  %v3243_v0 = vpop.permute.xlu1 %1384 }
  0xc0   : > { %v1974_v19 = vcombine.low %v3236_v44, %v3233_v51  ;;  %1083 = vrot.lane.b32.xlu1 %v1036_v20, %s2714_s8  ;;  %v755_v20 = vcombine.high %v3108_v23, %v3121_v54  ;;  %v301_v22 = vrot.slane %v4284_v38, %v3017_v8  ;;  %v3280_v23 = vrot.slane %v771_v28, %v2809_v11 }
  0xc1   : > { %v549_v54 = vcombine.high %v3111_v24, %v3101_v16 }
  0xc2   : > { %v3252_v55 = vrot.slane %v1974_v19, %v3017_v8  ;;  %827 = vrot.lane.b32.xlu0 %v733_v62, %s2711_s5  ;;  %v3267_v19 = vrot.slane %v1504_v60, %v3017_v8  ;;  %v3283_v39 = vrot.slane %v755_v20, %v2809_v11 }
  0xc3   : > { %v3256_v48 = vpop.permute.xlu0 %1388  ;;  %v3258_v3 = vpop.permute.xlu1 %1392  ;;  %v563_v28 = vrot.slane %v549_v54, %v3017_v8 }
  0xc4   : > { %4281 = vst [vmem:[#allocation14_spill] sm:$0xff] %v3252_v55  ;;  %v2006_v18 = vcombine.high %v3252_v55, %v4282_v5  ;;  %4283 = vst [vmem:[#allocation15_spill] sm:$0xff] %v3267_v19  ;;  %v1536_v60 = vcombine.high %v3267_v19, %v4282_v5  ;;  %v802_v20 = vcombine.low %v3283_v39, %v3280_v23 }
  0xc5   : > { %v1404_v16 = vcombine.low %v3239_v26, %v3256_v48  ;;  %v1420_v24 = vcombine.low %v3243_v0, %v3258_v3  ;;  %v498_v19 = vcombine.high %v488_v7, %v4282_v5 }
  0xc6   : > { %2039 = vrot.lane.b32.xlu1 %v2006_v18, %s2710_s4  ;;  %1051 = vrot.lane.b32.xlu0 %v958_v47, %s2713_s7  ;;  %v242_v18 = vcombine.high %v224_v6, %v4282_v5  ;;  %v810_v54 = vrot.slane %v802_v20, %v3017_v8  ;;  %v4289_v20 = vcombine.high %v2864_v33, %v2861_v32 }
  0xc7   : > { %v3275_v12 = vpop.permute.xlu0 %1850  ;;  %v3277_v21 = vpop.permute.xlu1 %1854  ;;  %v3312_v59 = vrot.slane %v1404_v16, %v2809_v11  ;;  %v3315_v25 = vrot.slane %v1420_v24, %v2809_v11  ;;  %v1505_v24 = vcombine.high %v3229_v61, %v3226_v30  ;;  %v751_v32 = vcombine.high %v733_v62, %v4282_v5 }
  0xc8   : > { %4285 = vst [vmem:[#allocation16_spill] sm:$0xff] %v3275_v12  ;;  %4286 = vst [vmem:[#allocation17_spill] sm:$0xff] %v3277_v21  ;;  %v1033_v2 = vrot.slane %v4289_v20, %v3017_v8  ;;  %v968_v33 = vcombine.high %v958_v47, %v4282_v5 }
  0xc9   : > { %v3350_v61 = vrot.slane %v1505_v24, %v3017_v8 }
  0xca   : > { %354 = vrot.lane.b32.xlu1 %v301_v22, %s2713_s7  ;;  %1569 = vrot.lane.b32.xlu0 %v1536_v60, %s2710_s4 }
  0xcb   : > { %v3292_v38 = vpop.permute.xlu0 %1858  ;;  %v3294_v55 = vpop.permute.xlu1 %1862 }
  0xcc   : > { %4287 = vst [vmem:[#allocation18_spill] sm:$0xff] %v3292_v38  ;;  %4288 = vst [vmem:[#allocation19_spill] sm:$0xff] %v3294_v55  ;;  %v1874_v13 = vcombine.low %v3275_v12, %v3292_v38  ;;  %v1436_v12 = vcombine.low %v3312_v59, %v3315_v25 }
  0xce   : > { %617 = vrot.lane.b32.xlu1 %v563_v28, %s2715_s9  ;;  %322 = vrot.lane.b32.xlu0 %v242_v18, %s2712_s6  ;;  %v1890_v18 = vcombine.low %v3277_v21, %v3294_v55  ;;  %v3336_v21 = vrot.slane %v1874_v13, %v2809_v11  ;;  %v1975_v13 = vcombine.high %v3236_v44, %v3233_v51 }
  0xcf   : > { %v3305_v6 = vpop.permute.xlu0 %1134  ;;  %v3307_v60 = vpop.permute.xlu1 %1138  ;;  %v3357_v62 = vrot.slane %v1436_v12, %v3017_v8  ;;  %v311_v12 = vcombine.high %v301_v22, %v4282_v5  ;;  %v1694_v22 = vcombine.low %v2902_v37, %v2918_v43 }
  0xd0   : > { %v3339_v55 = vrot.slane %v1890_v18, %v2809_v11  ;;  %v1989_v24 = vrot.slane %v1975_v13, %v3017_v8  ;;  %v687_v13 = vcombine.high %v3136_v10, %v3147_v29  ;;  %v481_v29 = vcombine.high %v3181_v63, %v3178_v58 }
  0xd1   : > { %4290 = vst [vmem:[#allocation20_spill] sm:$0xff] %v3357_v62  ;;  %v1468_v44 = vcombine.high %v3357_v62, %v4282_v5 }
  0xd2   : > { %863 = vrot.lane.b32.xlu1 %v810_v54, %s2713_s7  ;;  %585 = vrot.lane.b32.xlu0 %v498_v19, %s2714_s8  ;;  %v1906_v18 = vcombine.low %v3336_v21, %v3339_v55 }
  0xd3   : > { %v3327_v7 = vpop.permute.xlu0 %1142  ;;  %v3329_v16 = vpop.permute.xlu1 %1146 }
  0xd4   : > { %v3370_v51 = vrot.slane %v1906_v18, %v3017_v8  ;;  %v1710_v18 = vcombine.low %v2899_v36, %v2915_v42 }
  0xd6   : > { %1087 = vrot.lane.b32.xlu1 %v1033_v2, %s2715_s9  ;;  %831 = vrot.lane.b32.xlu0 %v751_v32, %s2712_s6  ;;  %4291 = vst [vmem:[#allocation21_spill] sm:$0xff] %v3370_v51  ;;  %v1938_v62 = vcombine.high %v3370_v51, %v4282_v5  ;;  %v3404_v51 = vrot.slane %v687_v13, %v2809_v11 }
  0xd7   : > { %v3345_v19 = vpop.permute.xlu0 %1132  ;;  %v3347_v30 = vpop.permute.xlu1 %1136  ;;  %v3415_v58 = vrot.slane %v1710_v18, %v2809_v11  ;;  %v1037_v18 = vcombine.high %v1033_v2, %v4282_v5 }
  0xda   : > { %1573 = vrot.lane.b32.xlu1 %v3350_v61, %s2711_s5  ;;  %1055 = vrot.lane.b32.xlu0 %v968_v33, %s2714_s8  ;;  %v703_v33 = vcombine.high %v3134_v9, %v3145_v31  ;;  %v4294_v9 = vcombine.low %v2981_v56, %v2984_v57  ;;  %v567_v31 = vcombine.high %v563_v28, %v4282_v5 }
  0xdb   : > { %v3362_v47 = vpop.permute.xlu0 %1140  ;;  %v3364_v20 = vpop.permute.xlu1 %1144  ;;  %v3412_v28 = vrot.slane %v1694_v22, %v2809_v11 }
  0xdc   : > { %v233_v10 = vrot.slane %v4294_v9, %v3017_v8 }
  0xde   : > { %2043 = vrot.lane.b32.xlu1 %v1989_v24, %s2711_s5  ;;  %1541 = vrot.lane.b32.xlu0 %v1468_v44, %s2710_s4 }
  0xdf   : > { %v3375_v32 = vpop.permute.xlu1 %2110  ;;  %v3383_v38 = vpop.permute.xlu0 %2106 }
  0xe0   : > { %4292 = vst [vmem:[#allocation22_spill] sm:$0xff] %v3375_v32  ;;  %4293 = vst [vmem:[#allocation23_spill] sm:$0xff] %v3383_v38  ;;  %v1240_v32 = vcombine.low %v3307_v60, %v3329_v16 }
  0xe2   : > { %358 = vrot.lane.b32.xlu1 %v311_v12, %s2714_s8  ;;  %2011 = vrot.lane.b32.xlu0 %v1938_v62, %s2710_s4  ;;  %v3401_v12 = vrot.slane %v703_v33, %v2809_v11  ;;  %v1224_v62 = vcombine.low %v3305_v6, %v3327_v7  ;;  %v820_v33 = vcombine.high %v810_v54, %v4282_v5 }
  0xe3   : > { %v3398_v44 = vpop.permute.xlu1 %2118  ;;  %v3418_v63 = vpop.permute.xlu0 %2114  ;;  %v3425_v9 = vrot.slane %v1240_v32, %v2809_v11  ;;  %v1726_v54 = vcombine.low %v3412_v28, %v3415_v58  ;;  %v951_v32 = vcombine.high %v3213_v45, %v3216_v46 }
  0xe4   : > { %4295 = vst [vmem:[#allocation24_spill] sm:$0xff] %v3398_v44  ;;  %4296 = vst [vmem:[#allocation25_spill] sm:$0xff] %v3418_v63  ;;  %v3422_v13 = vrot.slane %v1224_v62, %v2809_v11  ;;  %v734_v22 = vcombine.low %v3404_v51, %v3401_v12 }
  0xe5   : > { %v965_v63 = vrot.slane %v951_v32, %v3017_v8  ;;  %v2007_v32 = vcombine.high %v1989_v24, %v4282_v5  ;;  %v243_v24 = vcombine.high %v233_v10, %v4282_v5 }
  0xe6   : > { %621 = vrot.lane.b32.xlu1 %v567_v31, %s2716_s10  ;;  %326 = vrot.lane.b32.xlu0 %v233_v10, %s2713_s7  ;;  %v495_v31 = vrot.slane %v481_v29, %v3017_v8  ;;  %v1437_v29 = vcombine.high %v3312_v59, %v3315_v25  ;;  %v1256_v62 = vcombine.low %v3422_v13, %v3425_v9 }
  0xe7   : > { %v3432_v44 = vpop.permute.xlu1 %2108  ;;  %v3443_v38 = vpop.permute.xlu0 %2104  ;;  %v742_v2 = vrot.slane %v734_v22, %v3017_v8  ;;  %v969_v10 = vcombine.high %v965_v63, %v4282_v5 }
  0xe8   : > { %v3453_v45 = vrot.slane %v1437_v29, %v3017_v8  ;;  %v3458_v59 = vrot.slane %v1256_v62, %v3017_v8  ;;  %v1907_v29 = vcombine.high %v3336_v21, %v3339_v55  ;;  %v1537_v62 = vcombine.high %v3350_v61, %v4282_v5 }
  0xe9   : > { %v1156_v55 = vcombine.low %v3345_v19, %v3362_v47  ;;  %v1172_v21 = vcombine.low %v3347_v30, %v3364_v20 }
  0xea   : > { %867 = vrot.lane.b32.xlu1 %v820_v33, %s2714_s8  ;;  %589 = vrot.lane.b32.xlu0 %v495_v31, %s2715_s9  ;;  %v3448_v33 = vrot.slane %v1726_v54, %v3017_v8  ;;  %4298 = vst [vmem:[#allocation27_spill] sm:$0xff] %v3458_v59  ;;  %v1921_v61 = vrot.slane %v1907_v29, %v3017_v8 }
  0xeb   : > { %v3455_v25 = vpop.permute.xlu1 %2116  ;;  %v3464_v22 = vpop.permute.xlu0 %2112  ;;  %v3510_v29 = vrot.slane %v1172_v21, %v2809_v11  ;;  %v499_v21 = vcombine.high %v495_v31, %v4282_v5 }
  0xec   : > { %4297 = vst [vmem:[#allocation26_spill] sm:$0xff] %v3448_v33  ;;  %v1758_v46 = vcombine.high %v3448_v33, %v4282_v5 }
  0xee   : > { %1091 = vrot.lane.b32.xlu1 %v1037_v18, %s2716_s10  ;;  %835 = vrot.lane.b32.xlu0 %v742_v2, %s2713_s7  ;;  %v1288_v18 = vcombine.high %v3458_v59, %v4282_v5 }
  0xef   : > { %v3470_v54 = vpop.permute.xlu1 %1067  ;;  %v3478_v33 = vpop.permute.xlu0 %1039 }
  0xf0   : > { %4299 = vst [vmem:[#allocation28_spill] sm:$0xff] %v3478_v33 }
  0xf2   : > { %1545 = vrot.lane.b32.xlu1 %v3453_v45, %s2711_s5  ;;  %1059 = vrot.lane.b32.xlu0 %v965_v63, %s2715_s9  ;;  %v1257_v63 = vcombine.high %v3422_v13, %v3425_v9  ;;  %v1943_v13 = vcombine.high %v3189_v4, %v3210_v35 }
  0xf4   : > { %v1271_v31 = vrot.slane %v1257_v63, %v3017_v8 }
  0xf6   : > { %1791 = vrot.lane.b32.xlu1 %v1758_v46, %s2710_s4  ;;  %1321 = vrot.lane.b32.xlu0 %v1288_v18, %s2710_s4  ;;  %v4300_v46 = vcombine.high %v2909_v40, %v2912_v41  ;;  %v3488_v18 = vpop.permute.xlu1 %1071  ;;  %v3498_v40 = vpop.permute.xlu0 %342  ;;  %v1489_v41 = vcombine.high %v3160_v14, %v3172_v17  ;;  %v1626_v17 = vcombine.low %v2947_v49, %v2959_v52 }
  0xf7   : > { %4301 = vst [vmem:[#allocation29_spill] sm:$0xff] %v3498_v40  ;;  %v1642_v14 = vcombine.low %v2950_v50, %v2962_v53 }
  0xf8   : > { %v3485_v59 = vrot.slane %v4300_v46, %v3017_v8  ;;  %v3507_v46 = vrot.slane %v1156_v55, %v2809_v11 }
  0xfa   : > { %2047 = vrot.lane.b32.xlu1 %v2007_v32, %s2712_s6  ;;  %1577 = vrot.lane.b32.xlu0 %v1537_v62, %s2712_s6  ;;  %v1473_v32 = vcombine.high %v3162_v15, %v3174_v1  ;;  %v752_v62 = vcombine.high %v742_v2, %v4282_v5  ;;  %v3513_v33 = vpop.permute.xlu1 %1075  ;;  %v3522_v15 = vrot.slane %v1489_v41, %v2809_v11 }
  0xfb   : > { %v803_v2 = vcombine.high %v3283_v39, %v3280_v23  ;;  %v1188_v55 = vcombine.low %v3507_v46, %v3510_v29  ;;  %v3539_v41 = vrot.slane %v1626_v17, %v2809_v11  ;;  %v1959_v39 = vcombine.high %v3187_v34, %v3208_v27 }
  0xfc   : > { %v3525_v1 = vrot.slane %v1473_v32, %v2809_v11  ;;  %v3542_v32 = vrot.slane %v1642_v14, %v2809_v11  ;;  %v1727_v17 = vcombine.high %v3412_v28, %v3415_v58  ;;  %v3569_v27 = vrot.slane %v1943_v13, %v2809_v11 }
  0xfd   : > { %v3566_v4 = vrot.slane %v1959_v39, %v2809_v11 }
  0xfe   : > { %362 = vrot.lane.b32.xlu1 %v3485_v59, %s2715_s9  ;;  %2015 = vrot.lane.b32.xlu0 %v1921_v61, %s2711_s5  ;;  %v1520_v23 = vcombine.low %v3525_v1, %v3522_v15  ;;  %v3550_v9 = vpop.permute.xlu1 %346  ;;  %v1658_v34 = vcombine.low %v3539_v41, %v3542_v32  ;;  %v1741_v28 = vrot.slane %v1727_v17, %v3017_v8 }
  0xff   : > { %4302 = vst [vmem:[#allocation30_spill] sm:$0xff] %v3550_v9 }
 0x100   : > { %v1528_v35 = vrot.slane %v1520_v23, %v3017_v8  ;;  %v3580_v58 = vrot.slane %v1658_v34, %v3017_v8  ;;  %v1469_v23 = vcombine.high %v3453_v45, %v4282_v5  ;;  %v312_v45 = vcombine.high %v3485_v59, %v4282_v5 }
 0x101   : > { %v735_v59 = vcombine.high %v3404_v51, %v3401_v12 }
 0x102   : > { %839 = vrot.lane.b32.xlu1 %v752_v62, %s2714_s8  ;;  %330 = vrot.lane.b32.xlu0 %v243_v24, %s2714_s8  ;;  %v3534_v24 = vpop.permute.xlu0 %1043  ;;  %v817_v62 = vrot.slane %v803_v2, %v3017_v8  ;;  %v3574_v2 = vpop.permute.xlu1 %1079  ;;  %4304 = vst [vmem:[#allocation32_spill] sm:$0xff] %v3580_v58  ;;  %v1690_v13 = vcombine.high %v3580_v58, %v4282_v5 }
 0x104   : > { %v821_v40 = vcombine.high %v817_v62, %v4282_v5 }
 0x106   : > { %1063 = vrot.lane.b32.xlu1 %v969_v10, %s2716_s10  ;;  %593 = vrot.lane.b32.xlu0 %v499_v21, %s2716_s10  ;;  %v3555_v10 = vrot.slane %v1188_v55, %v3017_v8  ;;  %v3560_v14 = vpop.permute.xlu0 %314  ;;  %v1990_v55 = vcombine.low %v3569_v27, %v3566_v4 }
 0x108   : > { %4303 = vst [vmem:[#allocation31_spill] sm:$0xff] %v3555_v10  ;;  %v1220_v63 = vcombine.high %v3555_v10, %v4282_v5  ;;  %v1998_v17 = vrot.slane %v1990_v55, %v3017_v8  ;;  %v4306_v55 = vcombine.high %v2981_v56, %v2984_v57  ;;  %v1289_v56 = vcombine.high %v1271_v31, %v4282_v5 }
 0x10a   : > { %1325 = vrot.lane.b32.xlu1 %v1271_v31, %s2711_s5  ;;  %871 = vrot.lane.b32.xlu0 %v817_v62, %s2715_s9  ;;  %v3584_v21 = vpop.permute.xlu0 %1047  ;;  %v240_v58 = vrot.slane %v4306_v55, %v3017_v8  ;;  %v4308_v31 = vld [vmem:[#allocation16_spill] sm:$0xff]  ;;  %v4310_v55 = vld [vmem:[#allocation17_spill] sm:$0xff] }
 0x10e   : > { %1581 = vrot.lane.b32.xlu1 %v1528_v35, %s2713_s7  ;;  %1293 = vrot.lane.b32.xlu0 %v1220_v63, %s2710_s4  ;;  %v3588_v39 = vpop.permute.xlu1 %601 }
 0x110   : > { %v3595_v34 = vpop.permute.xlu0 %597 }
 0x112   : > { %1795 = vrot.lane.b32.xlu1 %v1741_v28, %s2711_s5  ;;  %1549 = vrot.lane.b32.xlu0 %v1469_v23, %s2712_s6  ;;  %v1939_v23 = vcombine.high %v1921_v61, %v4282_v5  ;;  %v1421_v61 = vcombine.high %v3243_v0, %v3258_v3  ;;  %v749_v3 = vrot.slane %v735_v59, %v3017_v8 }
 0x114   : > { %v3632_v51 = vrot.slane %v1421_v61, %v2809_v11  ;;  %v1759_v61 = vcombine.high %v1741_v28, %v4282_v5 }
 0x116   : > { %v3597_v63 = vpop.permute.xlu1 %573  ;;  %2051 = vrot.lane.b32.xlu1 %v1998_v17, %s2713_s7  ;;  %1763 = vrot.lane.b32.xlu0 %v1690_v13, %s2710_s4  ;;  %v1405_v13 = vcombine.high %v3239_v26, %v3256_v48  ;;  %v1189_v26 = vcombine.high %v3507_v46, %v3510_v29  ;;  %v1538_v48 = vcombine.high %v1528_v35, %v4282_v5 }
 0x117   : > { %4305 = vst [vmem:[#allocation33_spill] sm:$0xff] %v3597_v63  ;;  %v1659_v35 = vcombine.high %v3539_v41, %v3542_v32 }
 0x118   : > { %v3603_v10 = vpop.permute.xlu0 %569  ;;  %v3629_v57 = vrot.slane %v1405_v13, %v2809_v11  ;;  %v1203_v29 = vrot.slane %v1189_v26, %v3017_v8 }
 0x11a   : > { %v3606_v9 = vpop.permute.xlu1 %609  ;;  %366 = vrot.lane.b32.xlu1 %v312_v45, %s2716_s10  ;;  %2019 = vrot.lane.b32.xlu0 %v1939_v23, %s2712_s6  ;;  %v1452_v12 = vcombine.low %v3629_v57, %v3632_v51  ;;  %v4309_v23 = vld [vmem:[#allocation19_spill] sm:$0xff] }
 0x11b   : > { %v1891_v13 = vcombine.high %v4310_v55, %v4309_v23  ;;  %v1711_v55 = vcombine.high %v2899_v36, %v2915_v42  ;;  %v244_v36 = vcombine.high %v240_v58, %v4282_v5  ;;  %v1521_v42 = vcombine.high %v3525_v1, %v3522_v15 }
 0x11c   : > { %v3624_v45 = vpop.permute.xlu0 %605  ;;  %v1460_v28 = vrot.slane %v1452_v12, %v3017_v8  ;;  %v1221_v15 = vcombine.high %v1203_v29, %v4282_v5 }
 0x11d   : > { %v3666_v26 = vrot.slane %v1891_v13, %v2809_v11  ;;  %v753_v13 = vcombine.high %v749_v3, %v4282_v5 }
 0x11e   : > { %v3621_v63 = vpop.permute.xlu1 %855  ;;  %875 = vrot.lane.b32.xlu1 %v821_v40, %s2716_s10  ;;  %334 = vrot.lane.b32.xlu0 %v240_v58, %s2715_s9  ;;  %v4307_v40 = vld [vmem:[#allocation18_spill] sm:$0xff]  ;;  %v1535_v58 = vrot.slane %v1521_v42, %v3017_v8 }
 0x11f   : > { %v1875_v62 = vcombine.high %v4308_v31, %v4307_v40  ;;  %v1241_v40 = vcombine.high %v3307_v60, %v3329_v16  ;;  %v2008_v16 = vcombine.high %v1998_v17, %v4282_v5 }
 0x120   : > { %v3648_v46 = vpop.permute.xlu0 %577 }
 0x121   : > { %v3663_v31 = vrot.slane %v1875_v62, %v2809_v11  ;;  %v1695_v62 = vcombine.high %v2902_v37, %v2918_v43  ;;  %v3706_v37 = vrot.slane %v1711_v55, %v2809_v11  ;;  %v1991_v55 = vcombine.high %v3569_v27, %v3566_v4 }
 0x122   : > { %v3637_v0 = vpop.permute.xlu1 %851  ;;  %1329 = vrot.lane.b32.xlu1 %v1289_v56, %s2712_s6  ;;  %843 = vrot.lane.b32.xlu0 %v749_v3, %s2715_s9  ;;  %v1225_v56 = vcombine.high %v3305_v6, %v3327_v7  ;;  %v1673_v6 = vrot.slane %v1659_v35, %v3017_v8  ;;  %v3680_v7 = vrot.slane %v1241_v40, %v2809_v11 }
 0x123   : > { %v1922_v41 = vcombine.low %v3663_v31, %v3666_v26  ;;  %v2005_v4 = vrot.slane %v1991_v55, %v3017_v8 }
 0x124   : > { %v3677_v60 = vrot.slane %v1225_v56, %v2809_v11  ;;  %v3703_v56 = vrot.slane %v1695_v62, %v2809_v11 }
 0x125   : > { %v1930_v35 = vrot.slane %v1922_v41, %v3017_v8 }
 0x126   : > { %1585 = vrot.lane.b32.xlu1 %v1538_v48, %s2714_s8  ;;  %v3652_v59 = vpop.permute.xlu1 %350  ;;  %1297 = vrot.lane.b32.xlu0 %v1203_v29, %s2711_s5  ;;  %v1272_v17 = vcombine.low %v3677_v60, %v3680_v7  ;;  %v1470_v29 = vcombine.high %v1460_v28, %v4282_v5 }
 0x128   : > { %v3668_v48 = vpop.permute.xlu0 %823  ;;  %v1280_v3 = vrot.slane %v1272_v17, %v3017_v8 }
 0x12a   : > { %1799 = vrot.lane.b32.xlu1 %v1759_v61, %s2712_s6  ;;  %v3672_v23 = vpop.permute.xlu1 %613  ;;  %1553 = vrot.lane.b32.xlu0 %v1460_v28, %s2713_s7 }
 0x12c   : > { %v3685_v32 = vpop.permute.xlu0 %318 }
 0x12e   : > { %2055 = vrot.lane.b32.xlu1 %v2008_v16, %s2714_s8  ;;  %v3688_v12 = vpop.permute.xlu1 %859  ;;  %1767 = vrot.lane.b32.xlu0 %v1673_v6, %s2711_s5  ;;  %v1742_v16 = vcombine.low %v3703_v56, %v3706_v37 }
 0x130   : > { %v3698_v61 = vpop.permute.xlu0 %581  ;;  %v1750_v1 = vrot.slane %v1742_v16, %v3017_v8  ;;  %v1691_v16 = vcombine.high %v1673_v6, %v4282_v5  ;;  %v1290_v6 = vcombine.high %v1280_v3, %v4282_v5 }
 0x132   : > { %847 = vrot.lane.b32.xlu1 %v753_v13, %s2716_s10  ;;  %2023 = vrot.lane.b32.xlu0 %v1930_v35, %s2713_s7  ;;  %v3712_v43 = vpop.permute.xlu1 %1083  ;;  %v1157_v13 = vcombine.high %v3345_v19, %v3362_v47  ;;  %v1627_v47 = vcombine.high %v2947_v49, %v2959_v52 }
 0x134   : > { %v3715_v40 = vpop.permute.xlu0 %827  ;;  %v3748_v27 = vrot.slane %v1157_v13, %v2809_v11  ;;  %v3770_v49 = vrot.slane %v1627_v47, %v2809_v11 }
 0x136   : > { %1333 = vrot.lane.b32.xlu1 %v1280_v3, %s2713_s7  ;;  %338 = vrot.lane.b32.xlu0 %v244_v36, %s2716_s10  ;;  %v1173_v36 = vcombine.high %v3347_v30, %v3364_v20  ;;  %v1643_v20 = vcombine.high %v2950_v50, %v2962_v53  ;;  %v1539_v53 = vcombine.high %v1535_v58, %v4282_v5 }
 0x137   : > { %v1453_v3 = vcombine.high %v3629_v57, %v3632_v51  ;;  %v4311_v57 = vld [vmem:[#allocation10_spill] sm:$0xff] }
 0x138   : > { %v3721_v41 = vpop.permute.xlu1 %2039  ;;  %v3724_v62 = vpop.permute.xlu0 %1051  ;;  %v3751_v19 = vrot.slane %v1173_v36, %v2809_v11  ;;  %v1940_v36 = vcombine.high %v1930_v35, %v4282_v5  ;;  %v3773_v50 = vrot.slane %v1643_v20, %v2809_v11  ;;  %v631_v51 = vsel %vm369_vm0, %v4311_v57, %v3595_v34 }
 0x139   : > { %v632_v34 = vsel %vm371_vm1, %v631_v51, %v3588_v39  ;;  %v4313_v51 = vld [vmem:[#allocation9_spill] sm:$0xff] }
 0x13a   : > { %1589 = vrot.lane.b32.xlu1 %v1535_v58, %s2715_s9  ;;  %1301 = vrot.lane.b32.xlu0 %v1221_v15, %s2712_s6  ;;  %v1204_v55 = vcombine.low %v3748_v27, %v3751_v19  ;;  %v1674_v47 = vcombine.low %v3770_v49, %v3773_v50  ;;  %v1467_v58 = vrot.slane %v1453_v3, %v3017_v8 }
 0x13b   : > { %v1923_v3 = vcombine.high %v3663_v31, %v3666_v26  ;;  %v4312_v31 = vld [vmem:[#allocation7_spill] sm:$0xff] }
 0x13c   : > { %v3732_v17 = vpop.permute.xlu1 %354  ;;  %v3738_v42 = vpop.permute.xlu0 %1569  ;;  %v1212_v35 = vrot.slane %v1204_v55, %v3017_v8  ;;  %v1273_v55 = vcombine.high %v3677_v60, %v3680_v7  ;;  %v1101_v26 = vsel %vm369_vm0, %v4312_v31, %v3470_v54 }
 0x13d   : > { %v1937_v39 = vrot.slane %v1923_v3, %v3017_v8 }
 0x13e   : > { %1803 = vrot.lane.b32.xlu1 %v1750_v1, %s2713_s7  ;;  %1557 = vrot.lane.b32.xlu0 %v1470_v29, %s2714_s8  ;;  %v1287_v7 = vrot.slane %v1273_v55, %v3017_v8  ;;  %v370_v55 = vsel %vm369_vm0, %v4313_v51, %v3560_v14  ;;  %v1222_v31 = vcombine.high %v1212_v35, %v4282_v5  ;;  %v4315_v51 = vld [vmem:[#allocation23_spill] sm:$0xff] }
 0x140   : > { %v3744_v15 = vpop.permute.xlu1 %617  ;;  %v323_v30 = vpop.permute.xlu0 %322 }
 0x142   : > { %2059 = vrot.lane.b32.xlu1 %v2005_v4, %s2715_s9  ;;  %1771 = vrot.lane.b32.xlu0 %v1691_v16, %s2712_s6  ;;  %v1760_v16 = vcombine.high %v1750_v1, %v4282_v5  ;;  %v1682_v1 = vrot.slane %v1674_v47, %v3017_v8  ;;  %v633_v47 = vsel %vm373_vm2, %v632_v34, %v3624_v45 }
 0x143   : > { %v634_v45 = vsel %vm375_vm4, %v633_v47, %v3606_v9  ;;  %v372_v9 = vsel %vm371_vm1, %v370_v55, %v3685_v32  ;;  %v1743_v32 = vcombine.high %v3703_v56, %v3706_v37  ;;  %v1471_v56 = vcombine.high %v1467_v58, %v4282_v5 }
 0x144   : > { %v3759_v28 = vpop.permute.xlu1 %863  ;;  %v3764_v13 = vpop.permute.xlu0 %585  ;;  %v1692_v57 = vcombine.high %v1682_v1, %v4282_v5  ;;  %v635_v54 = vsel %vm377_vm3, %v634_v45, %v3672_v23 }
 0x145   : > { %v636_v3 = vsel %vm379_vm5, %v635_v54, %v3744_v15  ;;  %v2128_v15 = vcombine.low %v3443_v38, %v3464_v22  ;;  %v4317_v54 = vld [vmem:[#allocation22_spill] sm:$0xff] }
 0x146   : > { %1337 = vrot.lane.b32.xlu1 %v1290_v6, %s2714_s8  ;;  %2027 = vrot.lane.b32.xlu0 %v1940_v36, %s2714_s8 }
 0x148   : > { %v3775_v52 = vpop.permute.xlu1 %1087  ;;  %v3780_v29 = vpop.permute.xlu0 %831 }
 0x14a   : > { %1593 = vrot.lane.b32.xlu1 %v1539_v53, %s2716_s10  ;;  %1305 = vrot.lane.b32.xlu0 %v1212_v35, %s2713_s7  ;;  %v2009_v53 = vcombine.high %v2005_v4, %v4282_v5 }
 0x14c   : > { %v3788_v20 = vpop.permute.xlu1 %1573  ;;  %v3790_v6 = vpop.permute.xlu0 %1055 }
 0x14e   : > { %1807 = vrot.lane.b32.xlu1 %v1760_v16, %s2714_s8  ;;  %1561 = vrot.lane.b32.xlu0 %v1467_v58, %s2715_s9  ;;  %v1757_v58 = vrot.slane %v1743_v32, %v3017_v8 }
 0x150   : > { %v3801_v36 = vpop.permute.xlu1 %2043  ;;  %v3806_v16 = vpop.permute.xlu0 %1541 }
 0x152   : > { %2063 = vrot.lane.b32.xlu1 %v2009_v53, %s2716_s10  ;;  %1775 = vrot.lane.b32.xlu0 %v1682_v1, %s2713_s7  ;;  %v1102_v53 = vsel %vm371_vm1, %v1101_v26, %v3488_v18  ;;  %v374_v1 = vsel %vm373_vm2, %v372_v9, %v323_v30  ;;  %v2144_v30 = vcombine.low %v3432_v44, %v3455_v25 }
 0x153   : > { %v1103_v18 = vsel %vm373_vm2, %v1102_v53, %v3513_v33  ;;  %v1941_v26 = vcombine.high %v1937_v39, %v4282_v5  ;;  %v4316_v33 = vld [vmem:[#allocation24_spill] sm:$0xff] }
 0x154   : > { %v3814_v60 = vpop.permute.xlu1 %358  ;;  %v3820_v4 = vpop.permute.xlu0 %2011  ;;  %v2212_v53 = vcombine.low %v4317_v54, %v4316_v33  ;;  %v1104_v37 = vsel %vm375_vm4, %v1103_v18, %v3574_v2  ;;  %v2136_v2 = vrot.slane %v2128_v15, %v2809_v11 }
 0x156   : > { %1341 = vrot.lane.b32.xlu1 %v1287_v7, %s2715_s9  ;;  %2031 = vrot.lane.b32.xlu0 %v1937_v39, %s2715_s9  ;;  %v1205_v39 = vcombine.high %v3748_v27, %v3751_v19 }
 0x158   : > { %v622_v34 = vpop.permute.xlu1 %621  ;;  %v327_v14 = vpop.permute.xlu0 %326 }
 0x159   : > { %v637_v47 = vsel %vm381_vm6, %v636_v3, %v622_v34  ;;  %v3843_v45 = vsel %vm375_vm4, %v374_v1, %v327_v14  ;;  %v1291_v3 = vcombine.high %v1287_v7, %v4282_v5  ;;  %v4318_v34 = vld [vmem:[#allocation13_spill] sm:$0xff]  ;;  %v2152_v14 = vrot.slane %v2144_v30, %v2809_v11 }
 0x15a   : > { %v641_v23 = vrot.slane %v637_v47, 4  ;;  %1779 = vrot.lane.b32.xlu1 %v1692_v57, %s2714_s8  ;;  %1309 = vrot.lane.b32.xlu0 %v1222_v31, %s2714_s8  ;;  %v4314_v57 = vld [vmem:[#allocation25_spill] sm:$0xff]  ;;  %v878_v1 = vsel %vm369_vm0, %v4318_v34, %v3668_v48  ;;  %v1105_v47 = vsel %vm377_vm3, %v1104_v37, %v3712_v43  ;;  %v3888_v43 = vrot.slane %v2212_v53, %v2809_v11 }
 0x15b   : > { %v2196_v55 = vcombine.low %v4315_v51, %v4314_v57  ;;  %v879_v7 = vsel %vm371_vm1, %v878_v1, %v3715_v40  ;;  %v1106_v27 = vsel %vm379_vm5, %v1105_v47, %v3775_v52  ;;  %v1761_v40 = vcombine.high %v1757_v58, %v4282_v5 }
 0x15c   : > { %645 = vst [vmem:[#allocation2 + $0x8] sm:$0xf0] %v641_v23  ;;  %v3855_v35 = vpop.permute.xlu1 %867  ;;  %v3862_v9 = vpop.permute.xlu0 %589  ;;  %v880_v31 = vsel %vm373_vm2, %v879_v7, %v3780_v29  ;;  %v1675_v52 = vcombine.high %v3770_v49, %v3773_v50  ;;  %v2160_v30 = vcombine.low %v2136_v2, %v2152_v14  ;;  %v1219_v53 = vrot.slane %v1205_v39, %v3017_v8  ;;  %v4320_v7 = vld [vmem:[#allocation14_spill] sm:$0xff] }
 0x15d   : > { %v3885_v48 = vrot.slane %v2196_v55, %v2809_v11  ;;  %v2129_v47 = vcombine.high %v3443_v38, %v3464_v22 }
 0x15e   : > { %2035 = vrot.lane.b32.xlu1 %v1941_v26, %s2716_s10  ;;  %1565 = vrot.lane.b32.xlu0 %v1471_v56, %s2716_s10  ;;  %v4319_v26 = vld [vmem:[#allocation20_spill] sm:$0xff]  ;;  %v1689_v49 = vrot.slane %v1675_v52, %v3017_v8  ;;  %v3917_v34 = vrot.slane %v2160_v30, %v3017_v8 }
 0x15f   : > { %v1596_v29 = vsel %vm369_vm0, %v4319_v26, %v3806_v16  ;;  %v2228_v56 = vcombine.low %v3885_v48, %v3888_v43  ;;  %v1223_v16 = vcombine.high %v1219_v53, %v4282_v5  ;;  %v2143_v52 = vrot.slane %v2129_v47, %v2809_v11 }
 0x160   : > { %v1092_v19 = vpop.permute.xlu1 %1091  ;;  %v836_v18 = vpop.permute.xlu0 %835  ;;  %v2192_v38 = vcombine.high %v3917_v34, %v4282_v5 }
 0x161   : > { %v1107_v23 = vsel %vm381_vm6, %v1106_v27, %v1092_v19  ;;  %v3894_v15 = vsel %vm375_vm4, %v880_v31, %v836_v18  ;;  %v3922_v1 = vrot.slane %v2228_v56, %v3017_v8  ;;  %v2073_v27 = vsel %vm369_vm0, %v4320_v7, %v3721_v41  ;;  %v4321_v31 = vld [vmem:[#allocation15_spill] sm:$0xff]  ;;  %v4324_v56 = vld [vmem:[#allocation21_spill] sm:$0xff] }
 0x162   : > { %v1111_v32 = vrot.slane %v1107_v23, 4  ;;  %1345 = vrot.lane.b32.xlu1 %v1291_v3, %s2716_s10  ;;  %1811 = vrot.lane.b32.xlu0 %v1757_v58, %s2715_s9  ;;  %v2145_v58 = vcombine.high %v3432_v44, %v3455_v25  ;;  %v2161_v19 = vcombine.high %v2136_v2, %v2152_v14  ;;  %v1603_v23 = vsel %vm369_vm0, %v4321_v31, %v3738_v42  ;;  %v4322_v42 = vld [vmem:[#allocation28_spill] sm:$0xff] }
 0x163   : > { %v2074_v18 = vsel %vm371_vm1, %v2073_v27, %v3801_v36  ;;  %v1604_v44 = vsel %vm371_vm1, %v1603_v23, %v3788_v20  ;;  %v2260_v41 = vcombine.high %v3922_v1, %v4282_v5  ;;  %v4323_v36 = vld [vmem:[#allocation6_spill] sm:$0xff]  ;;  %v1693_v20 = vcombine.high %v1689_v49, %v4282_v5 }
 0x164   : > { %1115 = vst [vmem:[#allocation2 + $0x18] sm:$0xf0] %v1111_v32  ;;  %v1546_v55 = vpop.permute.xlu1 %1545  ;;  %v1060_v3 = vpop.permute.xlu0 %1059  ;;  %v1094_v14 = vsel %vm369_vm0, %v4323_v36, %v4322_v42  ;;  %v2159_v30 = vrot.slane %v2145_v58, %v2809_v11  ;;  %v4327_v36 = vld [vmem:[#allocation27_spill] sm:$0xff] }
 0x165   : > { %v3908_v37 = vsel %vm371_vm1, %v1596_v29, %v1546_v55  ;;  %v2175_v29 = vrot.slane %v2161_v19, %v3017_v8  ;;  %v2213_v55 = vcombine.high %v4317_v54, %v4316_v33 }
 0x166   : > { %1815 = vrot.lane.b32.xlu1 %v1761_v40, %s2716_s10  ;;  %1313 = vrot.lane.b32.xlu0 %v1219_v53, %s2715_s9  ;;  %v2197_v40 = vcombine.high %v4315_v51, %v4314_v57  ;;  %v2229_v53 = vcombine.high %v3885_v48, %v3888_v43  ;;  %v1095_v57 = vsel %vm371_vm1, %v1094_v14, %v3534_v24  ;;  %v4325_v51 = vld [vmem:[#allocation11_spill] sm:$0xff] }
 0x167   : > { %v624_v47 = vsel %vm369_vm0, %v4325_v51, %v3603_v10  ;;  %v2176_v54 = vcombine.low %v2143_v52, %v2159_v30  ;;  %v2227_v24 = vrot.slane %v2213_v55, %v2809_v11  ;;  %v1096_v43 = vsel %vm373_vm2, %v1095_v57, %v3584_v21  ;;  %v4326_v10 = vld [vmem:[#allocation33_spill] sm:$0xff] }
 0x168   : > { %v3913_v50 = vpop.permute.xlu1 %1791  ;;  %v3919_v39 = vpop.permute.xlu0 %1321  ;;  %v2211_v33 = vrot.slane %v2197_v40, %v2809_v11  ;;  %v625_v7 = vsel %vm371_vm1, %v624_v47, %v4326_v10  ;;  %v2243_v19 = vrot.slane %v2229_v53, %v3017_v8  ;;  %v1097_v23 = vsel %vm375_vm4, %v1096_v43, %v3724_v62  ;;  %v4329_v47 = vld [vmem:[#allocation29_spill] sm:$0xff] }
 0x169   : > { %v626_v31 = vsel %vm373_vm2, %v625_v7, %v3648_v46  ;;  %v1098_v21 = vsel %vm377_vm3, %v1097_v23, %v3790_v6  ;;  %v2184_v46 = vrot.slane %v2176_v54, %v3017_v8  ;;  %v1355_v14 = vsel %vm369_vm0, %v4327_v36, %v3919_v39  ;;  %v4330_v54 = vld [vmem:[#allocation8_spill] sm:$0xff] }
 0x16a   : > { %1317 = vrot.lane.b32.xlu1 %v1223_v16, %s2716_s10  ;;  %1783 = vrot.lane.b32.xlu0 %v1689_v49, %s2715_s9  ;;  %v2066_v49 = vsel %vm369_vm0, %v4324_v56, %v3820_v4  ;;  %v2193_v4 = vcombine.high %v2175_v29, %v4282_v5  ;;  %v627_v11 = vsel %vm375_vm4, %v626_v31, %v3698_v61  ;;  %v4332_v31 = vld [vmem:[#allocation12_spill] sm:$0xff] }
 0x16b   : > { %v2245_v39 = vcombine.high %v2211_v33, %v2227_v24  ;;  %v885_v23 = vsel %vm369_vm0, %v4332_v31, %v3637_v0 }
 0x16c   : > { %v2048_v32 = vpop.permute.xlu1 %2047  ;;  %v1578_v22 = vpop.permute.xlu0 %1577 }
 0x16d   : > { %v3943_v25 = vsel %vm373_vm2, %v2074_v18, %v2048_v32  ;;  %v3948_v2 = vsel %vm373_vm2, %v1604_v44, %v1578_v22  ;;  %v628_v18 = vsel %vm377_vm3, %v627_v11, %v3764_v13  ;;  %v1099_v32 = vsel %vm379_vm5, %v1098_v21, %v1060_v3  ;;  %v2349_v21 = vld [vmem:[%s4243_s2 + $0x8] sm:$0xff] }
 0x16e   : > { %2265 = vrot.lane.b32.xlu1 %v2192_v38, %s2710_s4  ;;  %2293 = vrot.lane.b32.xlu0 %v2260_v41, %s2710_s4  ;;  %v2244_v44 = vcombine.low %v2211_v33, %v2227_v24  ;;  %v629_v62 = vsel %vm379_vm5, %v628_v18, %v3862_v9  ;;  %v2261_v41 = vcombine.high %v2243_v19, %v4282_v5 }
 0x16f   : > { %v2177_v3 = vcombine.high %v2143_v52, %v2159_v30  ;;  %v2259_v43 = vrot.slane %v2245_v39, %v3017_v8 }
 0x170   : > { %v3960_v26 = vpop.permute.xlu1 %362  ;;  %v2016_v16 = vpop.permute.xlu0 %2015  ;;  %v2252_v55 = vrot.slane %v2244_v44, %v3017_v8 }
 0x171   : > { %v3976_v58 = vsel %vm371_vm1, %v2066_v49, %v2016_v16  ;;  %v2191_v30 = vrot.slane %v2177_v3, %v3017_v8  ;;  %v4328_v49 = vld [vmem:[#allocation26_spill] sm:$0xff] }
 0x172   : > { %2269 = vrot.lane.b32.xlu1 %v2175_v29, %s2711_s5  ;;  %1787 = vrot.lane.b32.xlu0 %v1693_v20, %s2716_s10  ;;  %v2194_v20 = vcombine.high %v2184_v46, %v4282_v5  ;;  %v2262_v56 = vcombine.high %v2252_v55, %v4282_v5  ;;  %v1825_v16 = vsel %vm369_vm0, %v4328_v49, %v3913_v50  ;;  %v4331_v50 = vld [vmem:[#allocation30_spill] sm:$0xff] }
 0x173   : > { %v2195_v51 = vcombine.high %v2191_v30, %v4282_v5 }
 0x174   : > { %v3981_v48 = vpop.permute.xlu1 %839  ;;  %v3989_v27 = vpop.permute.xlu0 %330 }
 0x175   : > { %v378_v49 = vsel %vm377_vm3, %v3843_v45, %v3989_v27 }
 0x176   : > { %2273 = vrot.lane.b32.xlu1 %v2193_v4, %s2712_s6  ;;  %2297 = vrot.lane.b32.xlu0 %v2243_v19, %s2711_s5  ;;  %v383_v4 = vsel %vm369_vm0, %v4330_v54, %v4329_v47  ;;  %s2469_s5 = sshll.u32 %s163_s30, 4  ;;  %s4192_s5 = int_to_ptr.vmem [resolvable:$true] %s2469_s5 }
 0x177   : > { %v384_v7 = vsel %vm371_vm1, %v383_v4, %v4331_v50  ;;  %p2648_p0 = scmp.lt.s32.totalorder %s4192_s5, %s2646_s17 }
 0x178   : > { %v1064_v38 = vpop.permute.xlu1 %1063  ;;  %v594_v61 = vpop.permute.xlu0 %593  ;;  %v385_v8 = vsel %vm373_vm2, %v384_v7, %v3652_v59  ;;  %v886_v59 = vsel %vm371_vm1, %v885_v23, %v3621_v63 }
 0x179   : > { %v1100_v22 = vsel %vm381_vm6, %v1099_v32, %v1064_v38  ;;  %v630_v42 = vsel %vm381_vm6, %v629_v62, %v594_v61  ;;  %v386_v18 = vsel %vm375_vm4, %v385_v8, %v3732_v17  ;;  %v2717_v32 = vmov 0   ;;  %v2348_v17 = vld [vmem:[%s4243_s2] sm:$0xff] }
 0x17a   : > { %v1110_v6 = vrot.slane %v1100_v22, 4  ;;  %2277 = vrot.lane.b32.xlu1 %v2184_v46, %s2713_s7  ;;  %v640_v13 = vrot.slane %v630_v42, 4  ;;  %2301 = vrot.lane.b32.xlu0 %v2261_v41, %s2712_s6  ;;  %v387_v0 = vsel %vm377_vm3, %v386_v18, %v3814_v60  ;;  %v887_v46 = vsel %vm373_vm2, %v886_v59, %v3688_v12  ;;  %s2546_s6 = sshll.u32 %s2761_s16, 9  ;;  %s4199_s16 = scalar_lea.sflag [#allocation4], %s161_s28 }
 0x17b   : > { %2616 = vset.pattern.permute.xlu1 %v2717_v32  ;;  %2615 = vset.pattern.permute.xlu0 %v2717_v32  ;;  %v888_v62 = vsel %vm375_vm4, %v887_v46, %v3759_v28 }
 0x17c   : > { %1114 = vst [vmem:[#allocation2 + $0x10] sm:$0xf0] %v1110_v6  ;;  %v1326_v9 = vpop.permute.xlu1 %1325  ;;  %644 = vst [vmem:[#allocation2] sm:$0xf0] %v640_v13  ;;  %v872_v29 = vpop.permute.xlu0 %871  ;;  %v889_v63 = vsel %vm377_vm3, %v888_v62, %v3855_v35 }
 0x17d   : > { %v4018_v40 = vsel %vm371_vm1, %v1355_v14, %v1326_v9 }
 0x17e   : > { %2281 = vrot.lane.b32.xlu1 %v2194_v20, %s2714_s8  ;;  %2305 = vrot.lane.b32.xlu0 %v2252_v55, %s2713_s7 }
 0x180   : > { %v4023_v52 = vpop.permute.xlu1 %1581  ;;  %v4026_v53 = vpop.permute.xlu0 %1293 }
 0x181   : > { %v1606_v23 = vsel %vm375_vm4, %v3948_v2, %v4023_v52 }
 0x182   : > { %2285 = vrot.lane.b32.xlu1 %v2191_v30, %s2715_s9  ;;  %2309 = vrot.lane.b32.xlu0 %v2262_v56, %s2714_s8 }
 0x184   : > { %v1796_v57 = vpop.permute.xlu1 %1795  ;;  %v1550_v24 = vpop.permute.xlu0 %1549 }
 0x185   : > { %v4039_v33 = vsel %vm371_vm1, %v1825_v16, %v1796_v57  ;;  %v4044_v10 = vsel %vm373_vm2, %v3908_v37, %v1550_v24  ;;  %v2263_v37 = vcombine.high %v2259_v43, %v4282_v5  ;;  %v388_v5 = vsel %vm379_vm5, %v387_v0, %v3960_v26 }
 0x186   : > { %2289 = vrot.lane.b32.xlu1 %v2195_v51, %s2716_s10  ;;  %2313 = vrot.lane.b32.xlu0 %v2259_v43, %s2715_s9  ;;  %v890_v26 = vsel %vm379_vm5, %v889_v63, %v872_v29  ;;  %v882_v29 = vsel %vm377_vm3, %v3894_v15, %v3981_v48  ;;  %s4197_s9 = scalar_lea.hbm %s4244_s3, %s2546_s6 }
 0x188   : > { %v4050_v19 = vpop.permute.xlu1 %2051  ;;  %v4057_v11 = vpop.permute.xlu0 %1763 }
 0x18a   : > { %2317 = vrot.lane.b32.xlu0 %v2263_v37, %s2716_s10  ;;  %2357 = vperm.xlu1 %2616, %v2349_v21   ;;  %s2641_s10 = scalar_lea.vmem %s4192_s5, 512 }
 0x18b   : > { %p2642_p11 = scmp.ne.s32.totalorder %s4192_s5, %s2641_s10  ;;  %p2649_p1 = scmp.lt.s32.totalorder %s2647_s19, %s2641_s10 }
 0x18c   : > { %v367_v38 = vpop.permute.xlu1 %366  ;;  %v4078_v60 = vpop.permute.xlu0 %2019 }
 0x18d   : > { %v389_v44 = vsel %vm381_vm6, %v388_v5, %v367_v38  ;;  %v2076_v38 = vsel %vm375_vm4, %v3943_v25, %v4050_v19  ;;  %p2643_p12 = pnand %p2642_p11, %p2778_p5  ;;  %p2650_p2 = por %p2649_p1, %p2648_p0 }
 0x18e   : > { %391 = vst [vmem:[#allocation2 + $0x8] sm:$0xf] %v389_v44  ;;  %2352 = vperm.xlu0 %2615, %v2348_v17  }
 0x18f   : > { %p2644_p13 = pneg %p2643_p12 }
 0x190   : > { %v876_v22 = vpop.permute.xlu1 %875  ;;  %v335_v41 = vpop.permute.xlu0 %334 }
 0x191   : > { %v891_v61 = vsel %vm381_vm6, %v890_v26, %v876_v22  ;;  %v380_v57 = vsel %vm379_vm5, %v378_v49, %v335_v41  ;;  %p2651_p3 = pnand %p2650_p2, %p2644_p13 }
 0x192   : > { %893 = vst [vmem:[#allocation2 + $0x18] sm:$0xf] %v891_v61  ;;  %v2068_v61 = vsel %vm373_vm2, %v3976_v58, %v4078_v60 }
 0x194   : > { %v4086_v12 = vpop.permute.xlu1 %1329  ;;  %v844_v6 = vpop.permute.xlu0 %843 }
 0x195   : > { %v2339_v3 = vld [vmem:[#allocation2 + $0x8] sm:$0xff]  ;;  %v883_v55 = vsel %vm379_vm5, %v882_v29, %v844_v6 }
 0x198   : > { %v1586_v42 = vpop.permute.xlu1 %1585  ;;  %v4088_v13 = vpop.permute.xlu0 %1297 }
 0x199   : > { %v2341_v28 = vld [vmem:[#allocation2 + $0x18] sm:$0xff]  ;;  %v1607_v8 = vsel %vm377_vm3, %v1606_v23, %v1586_v42 }
 0x19a   : > { %v2547_v36 = vpack.c.bf16 %v2341_v28, %v2339_v3 }
 0x19c   : > { %v4090_v14 = vpop.permute.xlu1 %1799  ;;  %2548 = vmatprep.subr.bf16.mxu0 %v2547_v36  ;;  %2555 = vmatprep.subr.bf16.mxu1 %v2547_v36  ;;  %v1554_v35 = vpop.permute.xlu0 %1553  ;;  %v1357_v36 = vsel %vm373_vm2, %v4018_v40, %v4086_v12 }
 0x19d   : > { %v1599_v19 = vsel %vm375_vm4, %v4044_v10, %v1554_v35  ;;  %v1827_v40 = vsel %vm373_vm2, %v4039_v33, %v4090_v14 }
 0x1a0   : > { %v2056_v9 = vpop.permute.xlu1 %2055  ;;  %v4092_v20 = vpop.permute.xlu0 %1767 }
 0x1a1   : > { %v2077_v17 = vsel %vm377_vm3, %v2076_v38, %v2056_v9 }
 0x1a4   : > { %v848_v30 = vpop.permute.xlu1 %847  ;;  %v2024_v56 = vpop.permute.xlu0 %2023 }
 0x1a5   : > { %v884_v39 = vsel %vm381_vm6, %v883_v55, %v848_v30  ;;  %v2069_v25 = vsel %vm375_vm4, %v2068_v61, %v2024_v56 }
 0x1a6   : > { %892 = vst [vmem:[#allocation2 + $0x10] sm:$0xf] %v884_v39 }
 0x1a8   : > { %v1334_v16 = vpop.permute.xlu1 %1333  ;;  %v339_v51 = vpop.permute.xlu0 %338 }
 0x1a9   : > { %v382_v47 = vsel %vm381_vm6, %v380_v57, %v339_v51  ;;  %v1358_v29 = vsel %vm375_vm4, %v1357_v36, %v1334_v16  ;;  %v4333_v57 = vld [vmem:[#allocation31_spill] sm:$0xff] }
 0x1aa   : > { %390 = vst [vmem:[#allocation2] sm:$0xf] %v382_v47  ;;  %v1348_v51 = vsel %vm369_vm0, %v4333_v57, %v4026_v53 }
 0x1ac   : > { %v1590_v54 = vpop.permute.xlu1 %1589  ;;  %v4104_v15 = vpop.permute.xlu0 %1301 }
 0x1ad   : > { %v2340_v43 = vld [vmem:[#allocation2 + $0x10] sm:$0xff]  ;;  %v1608_v37 = vsel %vm379_vm5, %v1607_v8, %v1590_v54  ;;  %v1349_v54 = vsel %vm371_vm1, %v1348_v51, %v4088_v13 }
 0x1ae   : > { %v1350_v33 = vsel %vm373_vm2, %v1349_v54, %v4104_v15 }
 0x1b0   : > { %v1804_v48 = vpop.permute.xlu1 %1803  ;;  %v1558_v4 = vpop.permute.xlu0 %1557 }
 0x1b1   : > { %v2338_v24 = vld [vmem:[#allocation2] sm:$0xff]  ;;  %v1600_v42 = vsel %vm377_vm3, %v1599_v19, %v1558_v4  ;;  %v1828_v16 = vsel %vm375_vm4, %v1827_v40, %v1804_v48  ;;  %v2337_v40 = vld [vmem:[%s4242_s1 + $0x8] sm:$0xff] }
 0x1b2   : > { %v2549_v50 = vpack.c.bf16 %v2340_v43, %v2338_v24 }
 0x1b4   : > { %v2060_v7 = vpop.permute.xlu1 %2059  ;;  %2550 = vmatpush1.bf16.msra.mxu0 %v2549_v50  ;;  %2558 = vmatpush1.bf16.msra.mxu1 %v2549_v50  ;;  %v4106_v31 = vpop.permute.xlu0 %1771 }
 0x1b5   : > { %v2078_v2 = vsel %vm379_vm5, %v2077_v17, %v2060_v7 }
 0x1b8   : > { %v1338_v45 = vpop.permute.xlu1 %1337  ;;  %v2028_v27 = vpop.permute.xlu0 %2027 }
 0x1b9   : > { %v2070_v6 = vsel %vm377_vm3, %v2069_v25, %v2028_v27  ;;  %v1359_v35 = vsel %vm377_vm3, %v1358_v29, %v1338_v45  ;;  %v4334_v27 = vld [vmem:[#allocation32_spill] sm:$0xff] }
 0x1ba   : > { %v1818_v23 = vsel %vm369_vm0, %v4334_v27, %v4057_v11 }
 0x1bb   : > { %v1819_v8 = vsel %vm371_vm1, %v1818_v23, %v4092_v20 }
 0x1bc   : > { %v1594_v21 = vpop.permute.xlu1 %1593  ;;  %v1306_v32 = vpop.permute.xlu0 %1305 }
 0x1bd   : > { %v1609_v18 = vsel %vm381_vm6, %v1608_v37, %v1594_v21  ;;  %v1351_v48 = vsel %vm375_vm4, %v1350_v33, %v1306_v32  ;;  %v1820_v32 = vsel %vm373_vm2, %v1819_v8, %v4106_v31 }
 0x1be   : > { %v1613_v0 = vrot.slane %v1609_v18, 4 }
 0x1c0   : > { %1617 = vst [vmem:[#allocation2 + $0x28] sm:$0xf0] %v1613_v0  ;;  %v1808_v59 = vpop.permute.xlu1 %1807  ;;  %v1562_v5 = vpop.permute.xlu0 %1561 }
 0x1c1   : > { %v1601_v9 = vsel %vm379_vm5, %v1600_v42, %v1562_v5  ;;  %v1829_v47 = vsel %vm377_vm3, %v1828_v16, %v1808_v59 }
 0x1c4   : > { %v2064_v52 = vpop.permute.xlu1 %2063  ;;  %v1776_v44 = vpop.permute.xlu0 %1775 }
 0x1c5   : > { %v2079_v46 = vsel %vm381_vm6, %v2078_v2, %v2064_v52  ;;  %v1821_v59 = vsel %vm375_vm4, %v1820_v32, %v1776_v44 }
 0x1c6   : > { %v2083_v62 = vrot.slane %v2079_v46, 4 }
 0x1c8   : > { %2087 = vst [vmem:[#allocation2 + $0x38] sm:$0xf0] %v2083_v62  ;;  %v1342_v63 = vpop.permute.xlu1 %1341  ;;  %v2032_v26 = vpop.permute.xlu0 %2031 }
 0x1c9   : > { %v2071_v3 = vsel %vm379_vm5, %v2070_v6, %v2032_v26  ;;  %v1360_v39 = vsel %vm379_vm5, %v1359_v35, %v1342_v63 }
 0x1cc   : > { %v1780_v22 = vpop.permute.xlu1 %1779  ;;  %v1310_v41 = vpop.permute.xlu0 %1309 }
 0x1cd   : > { %v1352_v50 = vsel %vm377_vm3, %v1351_v48, %v1310_v41  ;;  %v1822_v5 = vsel %vm377_vm3, %v1821_v59, %v1780_v22 }
 0x1d0   : > { %v2036_v28 = vpop.permute.xlu1 %2035  ;;  %v1566_v60 = vpop.permute.xlu0 %1565 }
 0x1d1   : > { %v2072_v58 = vsel %vm381_vm6, %v2071_v3, %v2036_v28  ;;  %v1602_v10 = vsel %vm381_vm6, %v1601_v9, %v1566_v60 }
 0x1d2   : > { %v2082_v55 = vrot.slane %v2072_v58, 4  ;;  %v1612_v30 = vrot.slane %v1602_v10, 4 }
 0x1d4   : > { %2086 = vst [vmem:[#allocation2 + $0x30] sm:$0xf0] %v2082_v55  ;;  %v1346_v56 = vpop.permute.xlu1 %1345  ;;  %1616 = vst [vmem:[#allocation2 + $0x20] sm:$0xf0] %v1612_v30  ;;  %v1812_v49 = vpop.permute.xlu0 %1811 }
 0x1d5   : > { %v1361_v12 = vsel %vm381_vm6, %v1360_v39, %v1346_v56  ;;  %v1830_v4 = vsel %vm379_vm5, %v1829_v47, %v1812_v49  ;;  %v2336_v56 = vld [vmem:[%s4242_s1] sm:$0xff] }
 0x1d6   : > { %1363 = vst [vmem:[#allocation2 + $0x28] sm:$0xf] %v1361_v12 }
 0x1d8   : > { %v1816_v24 = vpop.permute.xlu1 %1815  ;;  %v1314_v43 = vpop.permute.xlu0 %1313 }
 0x1d9   : > { %v1831_v14 = vsel %vm381_vm6, %v1830_v4, %v1816_v24  ;;  %v1353_v53 = vsel %vm379_vm5, %v1352_v50, %v1314_v43 }
 0x1da   : > { %1833 = vst [vmem:[#allocation2 + $0x38] sm:$0xf] %v1831_v14 }
 0x1dc   : > { %v1318_v7 = vpop.permute.xlu1 %1317  ;;  %v1784_v13 = vpop.permute.xlu0 %1783 }
 0x1dd   : > { %v1354_v45 = vsel %vm381_vm6, %v1353_v53, %v1318_v7  ;;  %v2343_v21 = vld [vmem:[#allocation2 + $0x28] sm:$0xff]  ;;  %v1823_v11 = vsel %vm379_vm5, %v1822_v5, %v1784_v13 }
 0x1de   : > { %1362 = vst [vmem:[#allocation2 + $0x20] sm:$0xf] %v1354_v45 }
 0x1e0   : > { %v2266_v15 = vpop.permute.xlu1 %2265  ;;  %v2294_v37 = vpop.permute.xlu0 %2293 }
 0x1e1   : > { %v2345_v18 = vld [vmem:[#allocation2 + $0x38] sm:$0xff]  ;;  %v2320_v22 = vsel %vm369_vm0, %v3917_v34, %v2266_v15  ;;  %v2327_v28 = vsel %vm369_vm0, %v3922_v1, %v2294_v37 }
 0x1e2   : > { %v2551_v0 = vpack.c.bf16 %v2345_v18, %v2343_v21 }
 0x1e4   : > { %v2270_v38 = vpop.permute.xlu1 %2269  ;;  %2552 = vmatprep.subr.bf16.mxu0 %v2551_v0  ;;  %2556 = vmatprep.subr.bf16.mxu1 %v2551_v0  ;;  %v1788_v17 = vpop.permute.xlu0 %1787 }
 0x1e5   : > { %v1824_v2 = vsel %vm381_vm6, %v1823_v11, %v1788_v17  ;;  %v2342_v63 = vld [vmem:[#allocation2 + $0x20] sm:$0xff]  ;;  %v2321_v41 = vsel %vm371_vm1, %v2320_v22, %v2270_v38 }
 0x1e6   : > { %1832 = vst [vmem:[#allocation2 + $0x30] sm:$0xf] %v1824_v2 }
 0x1e8   : > { %v2274_v20 = vpop.permute.xlu1 %2273  ;;  %v2298_v52 = vpop.permute.xlu0 %2297 }
 0x1e9   : > { %v2322_v19 = vsel %vm373_vm2, %v2321_v41, %v2274_v20  ;;  %v2328_v58 = vsel %vm371_vm1, %v2327_v28, %v2298_v52 }
 0x1ec   : > { %v2278_v46 = vpop.permute.xlu1 %2277  ;;  %v2302_v62 = vpop.permute.xlu0 %2301 }
 0x1ed   : > { %v2344_v31 = vld [vmem:[#allocation2 + $0x30] sm:$0xff]  ;;  %v2323_v42 = vsel %vm375_vm4, %v2322_v19, %v2278_v46  ;;  %v2329_v29 = vsel %vm373_vm2, %v2328_v58, %v2302_v62 }
 0x1ee   : > { %v2553_v26 = vpack.c.bf16 %v2344_v31, %v2342_v63 }
 0x1f0   : > { %v2282_v61 = vpop.permute.xlu1 %2281  ;;  %2554 = vmatpush1.bf16.msra.mxu0 %v2553_v26  ;;  %2559 = vmatpush1.bf16.msra.mxu1 %v2553_v26  ;;  %v2306_v44 = vpop.permute.xlu0 %2305 }
 0x1f1   : > { %v2324_v3 = vsel %vm377_vm3, %v2323_v42, %v2282_v61  ;;  %v2330_v55 = vsel %vm375_vm4, %v2329_v29, %v2306_v44 }
 0x1f4   : > { %v2286_v25 = vpop.permute.xlu1 %2285  ;;  %v2310_v6 = vpop.permute.xlu0 %2309 }
 0x1f5   : > { %v2325_v36 = vsel %vm379_vm5, %v2324_v3, %v2286_v25  ;;  %v2331_v10 = vsel %vm377_vm3, %v2330_v55, %v2310_v6 }
 0x1f8   : > { %v2290_v9 = vpop.permute.xlu1 %2289  ;;  %v2314_v60 = vpop.permute.xlu0 %2313 }
 0x1f9   : > { %v2326_v34 = vsel %vm381_vm6, %v2325_v36, %v2290_v9  ;;  %v2332_v35 = vsel %vm379_vm5, %v2331_v10, %v2314_v60 }
 0x1fa   : > { %2334 = vst [vmem:[#allocation2 + $0x40] sm:$0xf] %v2326_v34 }
 0x1fc   : > { %v2318_v30 = vpop.permute.xlu0 %2317 }
 0x1fd   : > { %v2333_v1 = vsel %vm381_vm6, %v2332_v35, %v2318_v30 }
 0x1fe   : > { %2335 = vst [vmem:[#allocation2 + $0x48] sm:$0xf] %v2333_v1 }
 0x201   : > { %v2346_v12 = vld [vmem:[#allocation2 + $0x40] sm:$0xf] }
 0x205   : > { %v2347_v39 = vld [vmem:[#allocation2 + $0x48] sm:$0xf] }
 0x206   : > { %2537 = vmatprep.subr.msk.mxu0 %vm2367_vm7, %v2347_v39  ;;  %2557 = vmatprep.subr.msk.mxu1 %vm2367_vm7, %v2347_v39 }
 0x207   : > { %2538 = vmatpush1.msk.msra.mxu0 %vm2367_vm7, %v2346_v12  ;;  %2560 = vmatpush1.msk.msra.mxu1 %vm2367_vm7, %v2346_v12 }
 0x208   : > { %2539 = vmatmul.mubr.msk.f32.vlgmr.msra.gmra.mrb[0].mxu0 %vm2360_vm8, %v2336_v56  ;;  %2540 = vmatmul.mubr.msk.f32.vlgmr.msra.gmra.mrb[0].mxu1 %vm2360_vm8, %v2337_v40 }
 0x209   : > { %v2358_v49 = vpop.permute.xlu1 %2357 }
 0x20d   : > { %v2353_v16 = vpop.permute.xlu0 %2352 }
 0x2db   : > { %v2440_v57 = vpop.f32.mrb[0].mxu0  ;;  %v2446_v51 = vpop.f32.mrb[0].mxu1 }
 0x2dc   : > { %v2447_v47 = vadd.f32 %v2446_v51, %v2358_v49  ;;  %v2441_v54 = vadd.f32 %v2440_v57, %v2353_v16  ;;  %v2442_v4 = vpop.f32.mrb[1].mxu0  ;;  %v2448_v24 = vpop.f32.mrb[1].mxu1 }
 0x2dd   : > { %v2443_v33 = vadd.f32 %v2442_v4, %v2353_v16  ;;  %v2449_v14 = vadd.f32 %v2448_v24, %v2358_v49 }
 0x2de   : > { %2453 = vst [vmem:[%s163_s30 + $0x10] sm:$0xff] %v2447_v47  ;;  %2451 = vst [vmem:[%s163_s30] sm:$0xff] %v2441_v54 }
 0x2df   : > { %2452 = vst [vmem:[%s163_s30 + $0x8] sm:$0xff] %v2443_v33  ;;  %2454 = vst [vmem:[%s163_s30 + $0x18] sm:$0xff] %v2449_v14 }
 0x2e0   : > { %2654 = shalt.err (!%p2651_p3)
}
 0x2e1   : > { %s2655_s20 = scalar_lea.hbm %s4197_s9, 512  ;;  %s2659_s26 = scalar_lea.hbm %s4244_s3, 1024 }
 0x2e2   : > { %p2656_p4 = scmp.ne.s32.totalorder %s4197_s9, %s2655_s20  ;;  %p2660_p9 = scmp.lt.u32.totalorder %s4197_s9, %s4244_s3 }
 0x2e3   : > { %p2661_p10 = scmp.lt.u32.totalorder %s2659_s26, %s2655_s20  ;;  %p2663_p12 = scmp.lt.u32.totalorder %s2655_s20, %s4197_s9 }
 0x2e4   : > { %p2657_p7 = pnand %p2656_p4, %p2778_p5 }
 0x2e5   : > { %p2662_p11 = por %p2661_p10, %p2660_p9 }
 0x2e6   : > { %p2658_p8 = pneg %p2657_p7 }
 0x2e7   : > { %p2664_p13 = por %p2663_p12, %p2662_p11 }
 0x2e9   : > { %p2665_p0 = pnand %p2664_p13, %p2658_p8 }
 0x2eb   : > { %2668 = shalt.err (!%p2665_p0)
}
 0x2ec   : > { %s2719_s29 = smov 256  }
 0x2ed   : > { %2562 = dma.vmem_to_hbm [thread:$0]  (%p2778_p5), %s4192_s5, 512, %s4197_s9, %s4199_s16, %s2719_s29, %s2719_s29, %s2710_s4  }
 0x2ee PF: > { %p2568_p1 = scmp.ge.s32.totalorder %s2703_s15, 2  ;;  %s2484_s30 = sand.u32 1, %s2691_s12  }
 0x2ef   : > { %s2485_s6 = scalar_lea.sflag [#allocation4], %s2484_s30 }
 0x2f0   : > { %p2565_p2 = pnand %p2568_p1, %p2782_p6 }
 0x2f2   : > { %2686 = dma.done.wait (!%p2565_p2), %s2485_s6, 512  }
 0x2f3   : > { %2688 = vsyncadd (!%p2565_p2), %s2485_s6, 4294966784  ;;  %p13_p3 = scmp.ge.s32.totalorder %s2765_s18, 4   ;;  %s4335_s12 = smov %s2695_s13 }
 0x2f4   : > { %s4336_s13 = smov %s2699_s14  ;;  %s4337_s14 = smov %s2776_s21 }
 0x2f5   : > { %s4338_s15 = smov %s2765_s18  ;;  %15 = sbr.rel (!%p13_p3) target bundleno = 3 (0x3), region = 67 }
 0x2fc   :  { %2490 = vsyncpa [#allocation4], 1 }
 0x2fd   :  { %2492 = vsyncpa [#allocation4 + $0x1], 1 }

</bundles_post_ra>
